<compile_context>
chip_gen: v7x
topology: tpu7x:2x2x1
jax: 0.10.0
libtpu: 0.0.40
codegen_flags: <defaults>
</compile_context>

<pallas_src>
import functools

import jax
import jax.numpy as jnp
from jax import lax
from jax.experimental import pallas as pl
from jax.experimental.pallas import tpu as pltpu

EPS = 1e-5                       # matches torch.log(pdists + 1e-05) in the reference
_MATMUL_DTYPE = jnp.bfloat16     # MXU operand dtype (accumulation stays float32)


def make_grid(h, w, dtype=jnp.float32):
    gx = jnp.linspace(-1.0, 1.0, w, dtype=dtype)
    gy = jnp.linspace(-1.0, 1.0, h, dtype=dtype)
    u, v = jnp.meshgrid(gx, gy)                       # u[i, j] = gx[j], v[i, j] = gy[i]
    return jnp.stack([u, v], axis=2).reshape(h * w, 2)   # [..., 0] = x, [..., 1] = y


def _reflect(coord, size):
    """grid_sample(padding_mode='reflection', align_corners=False) fold (shared by
    the kernel and the plain-JAX band precompute so both see the same math)."""
    span = float(size)
    c = jnp.abs(coord + 0.5)                          # distance from the low border (-0.5)
    flips = jnp.floor(c / span)
    extra = c - span * flips
    odd = (flips - 2.0 * jnp.floor(flips * 0.5)) > 0.5
    return jnp.where(odd, span - extra - 0.5, extra - 0.5)


def _pick_tile(total, cap=512):
    """Largest tile <= cap that divides `total` and is a multiple of 128."""
    if total <= cap:
        return total
    for t in range(cap, 127, -128):
        if total % t == 0:
            return t
    # TODO(synk): pad HW to a multiple of 128 in the wrapper instead of falling back
    # to the full extent (only matters for images whose H*W is not 128-divisible).
    return total


def _source_tile_band(theta, cgrid, cparams, h, w, pt, qt, n_k):
    """Per (batch, destination tile): inclusive range [kmin, kmax] of source tiles
    that can receive non-zero bilinear weight.  Plain-JAX duplicate of the kernel's
    y-coordinate math with a +-1 source-row safety margin; O(HW*K) and cheap."""
    hw = h * w
    p = jnp.arange(hw, dtype=jnp.float32)
    py = jnp.floor((p + 0.5) / w)
    px = p - py * w
    gx = 2.0 * px / (w - 1.0) - 1.0
    gy = 2.0 * py / (h - 1.0) - 1.0
    sy = (theta[:, 1, 0:1] * gx[None, :] + theta[:, 1, 1:2] * gy[None, :]
          + theta[:, 1, 2:3])                                             # (B, HW)
    d = (jnp.abs(gx[None, :] - cgrid[:, 0:1])
         + jnp.abs(gy[None, :] - cgrid[:, 1:2]))                          # (K, HW)
    sy = sy + jnp.einsum("bk,kp->bp", cparams[:, 0, :], d * d * jnp.log(d + EPS))
    iy = (sy + 1.0) * (h * 0.5) - 0.5
    iy = jnp.clip(_reflect(iy, h), 0.0, h - 1.0)
    y0 = jnp.floor(iy)

    bsz = theta.shape[0]
    n_i = hw // pt
    y0 = y0.reshape(bsz, n_i, pt)
    rmin = jnp.clip(jnp.min(y0, axis=2) - 1.0, 0.0, h - 1.0).astype(jnp.int32)
    rmax = jnp.clip(jnp.max(y0, axis=2) + 2.0, 0.0, h - 1.0).astype(jnp.int32)
    kmin = jnp.clip((rmin * w) // qt, 0, n_k - 1).astype(jnp.int32)
    kmax = jnp.clip((rmax * w + (w - 1)) // qt, 0, n_k - 1).astype(jnp.int32)
    return kmin.reshape(-1), kmax.reshape(-1)


# ---------------------------------------------------------------------------
# Kernel 1: fused identity-grid warp + bilinear reflection grid-sample
# ---------------------------------------------------------------------------
def _transform_img_kernel(h, w, pt, qt, kmin_ref, kmax_ref,
                          theta_ref, cgrid_ref, cparams_ref, img_ref, out_ref):
    bi = pl.program_id(0)
    i = pl.program_id(1)
    c = img_ref.shape[2]

    # ---- destination tile (computed once per grid step): identity grid ->
    #      affine + TPS warp -> un-normalize -> reflect -> bilinear weights ----
    p = (i * pt + lax.broadcasted_iota(jnp.int32, (1, pt), 1)).astype(jnp.float32)
    py = jnp.floor((p + 0.5) / w)                 # robust integer row index
    px = p - py * w
    gx = 2.0 * px / (w - 1.0) - 1.0               # == linspace(-1, 1, w)[px]
    gy = 2.0 * py / (h - 1.0) - 1.0

    th = theta_ref[0]                             # (2, 3)
    a00 = th[0:1, 0:1]; a01 = th[0:1, 1:2]; a02 = th[0:1, 2:3]
    a10 = th[1:2, 0:1]; a11 = th[1:2, 1:2]; a12 = th[1:2, 2:3]
    sx = gx * a00 + gy * a01 + a02                # (1, pt)
    sy = gx * a10 + gy * a11 + a12

    cgx = cgrid_ref[:, 0:1]                       # (K, 1) control points on sublanes
    cgy = cgrid_ref[:, 1:2]
    cp = cparams_ref[0]                           # (K, 1)
    d = jnp.abs(gx - cgx) + jnp.abs(gy - cgy)     # (K, pt)
    tps = jnp.sum(d * d * jnp.log(d + EPS) * cp, axis=0, keepdims=True)   # (1, pt)
    sx = sx + tps                                 # same scalar TPS added to x and y,
    sy = sy + tps                                 # matching the reference broadcast

    ix = (sx + 1.0) * (w * 0.5) - 0.5             # align_corners=False un-normalize
    iy = (sy + 1.0) * (h * 0.5) - 0.5
    ix = jnp.clip(_reflect(ix, w), 0.0, w - 1.0)
    iy = jnp.clip(_reflect(iy, h), 0.0, h - 1.0)
    x0 = jnp.floor(ix); y0 = jnp.floor(iy)
    wx1 = ix - x0;      wy1 = iy - y0
    wx0 = 1.0 - wx1;    wy0 = 1.0 - wy1
    # corners one past the edge get zero weight (matches torch OOB masking)
    wx1 = jnp.where(x0 + 1.0 <= w - 1.0, wx1, 0.0)
    wy1 = jnp.where(y0 + 1.0 <= h - 1.0, wy1, 0.0)
    x1 = jnp.minimum(x0 + 1.0, w - 1.0)
    y1 = jnp.minimum(y0 + 1.0, h - 1.0)

    # ---- reduce only over the scalar-prefetched band of source tiles ----
    n_i = pl.num_programs(1)
    kmin = kmin_ref[bi * n_i + i]
    kmax = kmax_ref[bi * n_i + i]

    def body(kk, acc):
        src = img_ref[0, kk]                      # (C, qt), image resident in VMEM
        q = (kk * qt + lax.broadcasted_iota(jnp.int32, (qt, 1), 0)).astype(jnp.float32)
        qy = jnp.floor((q + 0.5) / w)             # (qt, 1)
        qx = q - qy * w
        # factorized one-hot sampling weights; equality tests stay in f32 (exact)
        row_w = jnp.where(qy == y0, wy0, 0.0) + jnp.where(qy == y1, wy1, 0.0)  # (qt, pt)
        col_w = jnp.where(qx == x0, wx0, 0.0) + jnp.where(qx == x1, wx1, 0.0)
        st = (row_w * col_w).astype(_MATMUL_DTYPE)   # S^T tile: (source q, dest p)
        # out[c, p] = sum_q img[c, q] * S[p, q]  -> lane-dense (C, pt) MXU result
        return acc + jnp.dot(src.astype(_MATMUL_DTYPE), st,
                             preferred_element_type=jnp.float32)

    acc = lax.fori_loop(kmin, kmax + 1, body, jnp.zeros((c, pt), jnp.float32))
    out_ref[...] = acc.astype(out_ref.dtype)[None]


def transform_img_pallas(img, theta, cgrid, cparams):
    b, c, h, w = img.shape
    hw = h * w
    kcp = cgrid.shape[0]
    pt = _pick_tile(hw)
    qt = _pick_tile(hw)
    n_i = hw // pt
    n_k = hw // qt

    # Source layout: (B, n_k, C, qt) so the inner loop indexes source tiles on a
    # leading axis; the whole image for one batch element stays resident in VMEM.
    img_src = img.reshape(b, c, n_k, qt).swapaxes(1, 2)
    cparams_k1 = jnp.swapaxes(cparams, 1, 2)      # (B, K, 1)
    kmin, kmax = _source_tile_band(theta, cgrid, cparams, h, w, pt, qt, n_k)

    kernel = functools.partial(_transform_img_kernel, h, w, pt, qt)
    # rough VMEM budget: double-buffered image block + output block + st temporaries
    vmem_bytes = (2 * n_k * max(c, 8) * qt * 4 + 2 * c * pt * 4
                  + 8 * qt * pt * 4 + (1 << 20))
    vmem_limit = int(min(max(vmem_bytes, 32 * 1024 * 1024), 64 * 1024 * 1024))

    out = pl.pallas_call(
        kernel,
        out_shape=jax.ShapeDtypeStruct((b, c, hw), img.dtype),
        grid_spec=pltpu.PrefetchScalarGridSpec(
            num_scalar_prefetch=2,
            grid=(b, n_i),
            in_specs=[
                pl.BlockSpec((1, 2, 3), lambda bi, i, *_: (bi, 0, 0)),
                pl.BlockSpec((kcp, 2), lambda bi, i, *_: (0, 0)),
                pl.BlockSpec((1, kcp, 1), lambda bi, i, *_: (bi, 0, 0)),
                pl.BlockSpec((1, n_k, c, qt), lambda bi, i, *_: (bi, 0, 0, 0)),
            ],
            out_specs=pl.BlockSpec((1, c, pt), lambda bi, i, *_: (bi, 0, i)),
        ),
        compiler_params=pltpu.CompilerParams(
            dimension_semantics=("parallel", "parallel"),
            vmem_limit_bytes=vmem_limit),
    )(kmin, kmax, theta, cgrid, cparams_k1, img_src)
    return out.reshape(b, c, h, w)


# ---------------------------------------------------------------------------
# Kernel 2: fused keypoint warp + analytic Jacobian + both L1 losses
# ---------------------------------------------------------------------------
def _kp_loss_kernel(rows, kp_t_ref, aff_ref, cgrid_ref, cp_ref,
                    kp_gt_ref, jac_det_ref, jac_gt_ref,
                    kpr_ref, lkp_ref, ljac_ref):
    x = kp_t_ref[:, 0:1]; y = kp_t_ref[:, 1:2]                    # (R, 1), R = B*N
    a00 = aff_ref[:, 0:1]; a01 = aff_ref[:, 1:2]; a02 = aff_ref[:, 2:3]
    a10 = aff_ref[:, 3:4]; a11 = aff_ref[:, 4:5]; a12 = aff_ref[:, 5:6]
    cgx = cgrid_ref[0:1, :]; cgy = cgrid_ref[1:2, :]              # (1, K)
    cp = cp_ref[...]                                              # (R, K)

    dx = x - cgx; dy = y - cgy                                    # (R, K)
    d = jnp.abs(dx) + jnp.abs(dy)                                 # pdists.abs().sum(3)
    logd = jnp.log(d + EPS)
    tps = jnp.sum(d * d * logd * cp, axis=1, keepdims=True)       # (R, 1)
    krx = x * a00 + y * a01 + a02 + tps                           # reconstructed kp
    kry = x * a10 + y * a11 + a12 + tps
    kpr_ref[:, 0:1] = krx
    kpr_ref[:, 1:2] = kry

    # --- L1 keypoint loss ---
    diff = jnp.abs(kp_gt_ref[:, 0:1] - krx) + jnp.abs(kp_gt_ref[:, 1:2] - kry)
    lkp_ref[...] = jnp.sum(diff, axis=0, keepdims=True) / float(rows * 2)

    # --- analytic Jacobian of the warp (replaces torch.autograd.grad) ---
    # d/dd [d^2 log(d+eps)] = 2 d log(d+eps) + d^2/(d+eps);  d|x - cx|/dx = sign(x - cx)
    dd = 2.0 * d * logd + d * d / (d + EPS)
    gxs = jnp.sum(dd * jnp.sign(dx) * cp, axis=1, keepdims=True)  # (R, 1)
    gys = jnp.sum(dd * jnp.sign(dy) * cp, axis=1, keepdims=True)
    t00 = a00 + gxs; t01 = a01 + gys
    t10 = a10 + gxs; t11 = a11 + gys

    j = jac_det_ref[...]                                          # (R, 4)
    j00 = j[:, 0:1]; j01 = j[:, 1:2]; j10 = j[:, 2:3]; j11 = j[:, 3:4]
    r00 = t00 * j00 + t01 * j10                                   # jac_recon = T @ J
    r01 = t00 * j01 + t01 * j11
    r10 = t10 * j00 + t11 * j10
    r11 = t10 * j01 + t11 * j11

    g = jac_gt_ref[...]                                           # ground-truth jac
    ga = g[:, 0:1]; gb = g[:, 1:2]; gc = g[:, 2:3]; gdd = g[:, 3:4]
    inv_det = 1.0 / (ga * gdd - gb * gc)                          # unguarded, like torch.linalg.inv
    i00 = gdd * inv_det; i01 = -gb * inv_det
    i10 = -gc * inv_det; i11 = ga * inv_det
    m00 = i00 * r00 + i01 * r10
    m01 = i00 * r01 + i01 * r11
    m10 = i10 * r00 + i11 * r10
    m11 = i10 * r01 + i11 * r11
    tot = jnp.abs(m00 - 1.0) + jnp.abs(m01) + jnp.abs(m10) + jnp.abs(m11 - 1.0)
    ljac_ref[...] = jnp.sum(tot, axis=0, keepdims=True) / float(rows * 4)


def kp_loss_pallas(kp_t, theta, cgrid_t, cparams, kp_gt, jac_det, jac_gt):
    b, n, _ = kp_t.shape
    rows = b * n
    kcp = cgrid_t.shape[1]
    aff = jnp.broadcast_to(theta.reshape(b, 1, 6), (b, n, 6)).reshape(rows, 6)
    cp = jnp.broadcast_to(cparams, (b, n, kcp)).reshape(rows, kcp)
    kernel = functools.partial(_kp_loss_kernel, rows)
    kpr, lkp, ljac = pl.pallas_call(
        kernel,
        out_shape=(jax.ShapeDtypeStruct((rows, 2), jnp.float32),
                   jax.ShapeDtypeStruct((1, 1), jnp.float32),
                   jax.ShapeDtypeStruct((1, 1), jnp.float32)),
    )(kp_t.reshape(rows, 2), aff, cgrid_t, cp,
      kp_gt.reshape(rows, 2), jac_det.reshape(rows, 4), jac_gt.reshape(rows, 4))
    return kpr.reshape(b, n, 2), lkp, ljac


# ---------------------------------------------------------------------------
# Module-level glue (mirrors the PyTorch Transform / EquivarianceLoss)
# ---------------------------------------------------------------------------
class Transform:
    def __init__(self, sigma_affine, sigma_tps, points_tps):
        self.sigma_affine = sigma_affine
        self.sigma_tps = sigma_tps
        self.points_tps = points_tps
        self.control_grid = make_grid(points_tps, points_tps)     # (K, 2)

    def sample_params(self, key, b, dtype=jnp.float32):
        k_aff, k_tps = jax.random.split(key)
        kcp = self.points_tps ** 2
        noise = self.sigma_affine * jax.random.normal(k_aff, (b, 2, 3), dtype)
        self.theta = noise + jnp.eye(2, 3, dtype=dtype)[None]                  # (B, 2, 3)
        self.control_params = self.sigma_tps * jax.random.normal(k_tps, (b, 1, kcp), dtype)

    def transform_img(self, img):                                              # img: NCHW
        return transform_img_pallas(img, self.theta,
                                    self.control_grid.astype(img.dtype),
                                    self.control_params)


class EquivarianceLoss:
    def __init__(self, sigma_affine, sigma_tps, points_tps):
        self.transform = Transform(sigma_affine, sigma_tps, points_tps)

    def __call__(self, key, img, kp, jac, kp_detector):
        b = img.shape[0]
        self.transform.sample_params(key, b, img.dtype)
        img_transformed = self.transform.transform_img(img)
        kp_transformed, jac_transformed = kp_detector(img_transformed)
        n = kp_transformed.shape[1]
        kp_recon, loss_kp, loss_jac = kp_loss_pallas(
            kp_transformed.astype(jnp.float32),
            self.transform.theta.astype(jnp.float32),
            self.transform.control_grid.T.astype(jnp.float32),
            self.transform.control_params.astype(jnp.float32),
            kp.astype(jnp.float32),
            jac_transformed.reshape(b, n, 4).astype(jnp.float32),
            jac.reshape(b, n, 4).astype(jnp.float32),
        )
        return (loss_kp[0, 0], loss_jac[0, 0], img_transformed,
                kp_transformed, kp_recon.astype(kp_transformed.dtype))


def make_kp_detector(key, c, h, w, num_kp):
    # Synthetic deterministic stand-in for the external keypoint detector
    # (kp_detector is a forward() argument, not part of EquivarianceLoss).
    k1, k2 = jax.random.split(key)
    wk = 0.01 * jax.random.normal(k1, (c * h * w, num_kp * 2), jnp.float32)
    wj = 0.01 * jax.random.normal(k2, (c * h * w, num_kp * 4), jnp.float32)

    def kp_detector(img):
        b = img.shape[0]
        flat = img.reshape(b, -1)
        kp = jnp.tanh(flat @ wk).reshape(b, num_kp, 2)
        jacm = jnp.eye(2, dtype=img.dtype)[None, None] + 0.1 * (flat @ wj).reshape(b, num_kp, 2, 2)
        return kp, jacm

    return kp_detector


if __name__ == "__main__":
    B, C, H, W = 2, 4, 16, 16
    N_KP = 10
    SIGMA_AFFINE, SIGMA_TPS, POINTS_TPS = 0.05, 0.005, 5

    key = jax.random.PRNGKey(0)
    k_img, k_det, k_tform = jax.random.split(key, 3)
    img = jax.random.uniform(k_img, (B, C, H, W), jnp.float32)

    kp_detector = make_kp_detector(k_det, C, H, W, N_KP)
    kp_gt, jac_gt = kp_detector(img)          # "ground truth" kp / jacobian inputs

    loss_mod = EquivarianceLoss(SIGMA_AFFINE, SIGMA_TPS, POINTS_TPS)
    out = loss_mod(k_tform, img, kp_gt, jac_gt, kp_detector)
    out = jax.block_until_ready(out)
    loss_kp, loss_jac, img_t, kp_t, kp_r = out

    assert img_t.shape == (B, C, H, W)
    assert kp_t.shape == (B, N_KP, 2) and kp_r.shape == (B, N_KP, 2)
    assert bool(jnp.isfinite(loss_kp)) and bool(jnp.isfinite(loss_jac))
    print("KERNEL_OK")
</pallas_src>

<mosaic_0001>
module attributes {stable_mosaic.version = 11 : i64} {
  func.func @_transform_img_kernel(%arg0: i32, %arg1: i32, %arg2: memref<2xi32, #tpu.memory_space<smem>>, %arg3: memref<2xi32, #tpu.memory_space<smem>>, %arg4: memref<1x2x3xf32, #tpu.memory_space<vmem>>, %arg5: memref<25x2xf32, #tpu.memory_space<vmem>>, %arg6: memref<1x25x1xf32, #tpu.memory_space<vmem>>, %arg7: memref<1x1x4x256xf32, #tpu.memory_space<vmem>>, %arg8: memref<1x4x256xf32, #tpu.memory_space<vmem>>) attributes {dimension_semantics = [#tpu.dimension_semantics<parallel>, #tpu.dimension_semantics<parallel>], iteration_bounds = array<i64: 2, 1>, scalar_prefetch = 2 : i64, scratch_operands = 0 : i64, tpu.core_type = #tpu.core_type<tc>, window_params = [{transform_indices = @transform_0, window_bounds = array<i64: 1, 2, 3>}, {pipeline_mode = #tpu.pipeline_mode<synchronous>, transform_indices = @transform_1, window_bounds = array<i64: 25, 2>}, {transform_indices = @transform_2, window_bounds = array<i64: 1, 25, 1>}, {transform_indices = @transform_3, window_bounds = array<i64: 1, 1, 4, 256>}, {transform_indices = @transform_4, window_bounds = array<i64: 1, 4, 256>}]} {
    %c256_i32 = arith.constant 256 : i32
    %0 = arith.muli %arg1, %c256_i32 : i32
    %1 = tpu.iota {dimensions = array<i32: 1>} : vector<1x256xi32>
    %2 = vector.broadcast %0 : i32 to vector<1x256xi32>
    %3 = arith.addi %2, %1 : vector<1x256xi32>
    %4 = arith.sitofp %3 : vector<1x256xi32> to vector<1x256xf32>
    %cst = arith.constant 5.000000e-01 : f32
    %5 = vector.broadcast %cst : f32 to vector<1x256xf32>
    %6 = arith.addf %4, %5 : vector<1x256xf32>
    %cst_0 = arith.constant 1.600000e+01 : f32
    %7 = vector.broadcast %cst_0 : f32 to vector<1x256xf32>
    %8 = arith.divf %6, %7 : vector<1x256xf32>
    %9 = math.floor %8 : vector<1x256xf32>
    %cst_1 = arith.constant 1.600000e+01 : f32
    %10 = vector.broadcast %cst_1 : f32 to vector<1x256xf32>
    %11 = arith.mulf %9, %10 : vector<1x256xf32>
    %12 = arith.subf %4, %11 : vector<1x256xf32>
    %cst_2 = arith.constant 2.000000e+00 : f32
    %13 = vector.broadcast %cst_2 : f32 to vector<1x256xf32>
    %14 = arith.mulf %13, %12 : vector<1x256xf32>
    %cst_3 = arith.constant 1.500000e+01 : f32
    %15 = vector.broadcast %cst_3 : f32 to vector<1x256xf32>
    %16 = arith.divf %14, %15 : vector<1x256xf32>
    %cst_4 = arith.constant 1.000000e+00 : f32
    %17 = vector.broadcast %cst_4 : f32 to vector<1x256xf32>
    %18 = arith.subf %16, %17 : vector<1x256xf32>
    %cst_5 = arith.constant 2.000000e+00 : f32
    %19 = vector.broadcast %cst_5 : f32 to vector<1x256xf32>
    %20 = arith.mulf %19, %9 : vector<1x256xf32>
    %cst_6 = arith.constant 1.500000e+01 : f32
    %21 = vector.broadcast %cst_6 : f32 to vector<1x256xf32>
    %22 = arith.divf %20, %21 : vector<1x256xf32>
    %cst_7 = arith.constant 1.000000e+00 : f32
    %23 = vector.broadcast %cst_7 : f32 to vector<1x256xf32>
    %24 = arith.subf %22, %23 : vector<1x256xf32>
    %c0 = arith.constant 0 : index
    %c0_8 = arith.constant 0 : index
    %c0_9 = arith.constant 0 : index
    %25 = vector.load %arg4[%c0, %c0_8, %c0_9] : memref<1x2x3xf32, #tpu.memory_space<vmem>>, vector<1x2x3xf32>
    %26 = vector.shape_cast %25 : vector<1x2x3xf32> to vector<2x3xf32>
    %27 = vector.extract_strided_slice %26 {offsets = [0, 0], sizes = [1, 1], strides = [1, 1]} : vector<2x3xf32> to vector<1x1xf32>
    %28 = vector.extract_strided_slice %26 {offsets = [0, 1], sizes = [1, 1], strides = [1, 1]} : vector<2x3xf32> to vector<1x1xf32>
    %29 = vector.extract_strided_slice %26 {offsets = [0, 2], sizes = [1, 1], strides = [1, 1]} : vector<2x3xf32> to vector<1x1xf32>
    %30 = vector.extract_strided_slice %26 {offsets = [1, 0], sizes = [1, 1], strides = [1, 1]} : vector<2x3xf32> to vector<1x1xf32>
    %31 = vector.extract_strided_slice %26 {offsets = [1, 1], sizes = [1, 1], strides = [1, 1]} : vector<2x3xf32> to vector<1x1xf32>
    %32 = vector.extract_strided_slice %26 {offsets = [1, 2], sizes = [1, 1], strides = [1, 1]} : vector<2x3xf32> to vector<1x1xf32>
    %33 = vector.broadcast %27 : vector<1x1xf32> to vector<1x256xf32>
    %34 = arith.mulf %18, %33 : vector<1x256xf32>
    %35 = vector.broadcast %28 : vector<1x1xf32> to vector<1x256xf32>
    %36 = arith.mulf %24, %35 : vector<1x256xf32>
    %37 = arith.addf %34, %36 : vector<1x256xf32>
    %38 = vector.broadcast %29 : vector<1x1xf32> to vector<1x256xf32>
    %39 = arith.addf %37, %38 : vector<1x256xf32>
    %40 = vector.broadcast %30 : vector<1x1xf32> to vector<1x256xf32>
    %41 = arith.mulf %18, %40 : vector<1x256xf32>
    %42 = vector.broadcast %31 : vector<1x1xf32> to vector<1x256xf32>
    %43 = arith.mulf %24, %42 : vector<1x256xf32>
    %44 = arith.addf %41, %43 : vector<1x256xf32>
    %45 = vector.broadcast %32 : vector<1x1xf32> to vector<1x256xf32>
    %46 = arith.addf %44, %45 : vector<1x256xf32>
    %c0_10 = arith.constant 0 : index
    %c0_11 = arith.constant 0 : index
    %47 = vector.load %arg5[%c0_10, %c0_11] : memref<25x2xf32, #tpu.memory_space<vmem>>, vector<25x1xf32>
    %c0_12 = arith.constant 0 : index
    %c1 = arith.constant 1 : index
    %48 = vector.load %arg5[%c0_12, %c1] : memref<25x2xf32, #tpu.memory_space<vmem>>, vector<25x1xf32>
    %c0_13 = arith.constant 0 : index
    %c0_14 = arith.constant 0 : index
    %c0_15 = arith.constant 0 : index
    %49 = vector.load %arg6[%c0_13, %c0_14, %c0_15] : memref<1x25x1xf32, #tpu.memory_space<vmem>>, vector<1x25x1xf32>
    %50 = vector.shape_cast %49 : vector<1x25x1xf32> to vector<25x1xf32>
    %51 = vector.broadcast %18 : vector<1x256xf32> to vector<25x256xf32>
    %52 = vector.broadcast %47 : vector<25x1xf32> to vector<25x256xf32>
    %53 = arith.subf %51, %52 : vector<25x256xf32>
    %54 = math.absf %53 : vector<25x256xf32>
    %55 = vector.broadcast %24 : vector<1x256xf32> to vector<25x256xf32>
    %56 = vector.broadcast %48 : vector<25x1xf32> to vector<25x256xf32>
    %57 = arith.subf %55, %56 : vector<25x256xf32>
    %58 = math.absf %57 : vector<25x256xf32>
    %59 = arith.addf %54, %58 : vector<25x256xf32>
    %60 = arith.mulf %59, %59 : vector<25x256xf32>
    %cst_16 = arith.constant 9.99999974E-6 : f32
    %61 = vector.broadcast %cst_16 : f32 to vector<25x256xf32>
    %62 = arith.addf %59, %61 : vector<25x256xf32>
    %63 = math.log %62 : vector<25x256xf32>
    %64 = arith.mulf %60, %63 : vector<25x256xf32>
    %65 = vector.broadcast %50 : vector<25x1xf32> to vector<25x256xf32>
    %66 = arith.mulf %64, %65 : vector<25x256xf32>
    %cst_17 = arith.constant dense<0.000000e+00> : vector<256xf32>
    %67 = vector.multi_reduction <add>, %66, %cst_17 [0] : vector<25x256xf32> to vector<256xf32>
    %68 = vector.shape_cast %67 : vector<256xf32> to vector<1x256xf32>
    %69 = arith.addf %39, %68 : vector<1x256xf32>
    %70 = arith.addf %46, %68 : vector<1x256xf32>
    %cst_18 = arith.constant 1.000000e+00 : f32
    %71 = vector.broadcast %cst_18 : f32 to vector<1x256xf32>
    %72 = arith.addf %69, %71 : vector<1x256xf32>
    %cst_19 = arith.constant 8.000000e+00 : f32
    %73 = vector.broadcast %cst_19 : f32 to vector<1x256xf32>
    %74 = arith.mulf %72, %73 : vector<1x256xf32>
    %cst_20 = arith.constant 5.000000e-01 : f32
    %75 = vector.broadcast %cst_20 : f32 to vector<1x256xf32>
    %76 = arith.subf %74, %75 : vector<1x256xf32>
    %cst_21 = arith.constant 1.000000e+00 : f32
    %77 = vector.broadcast %cst_21 : f32 to vector<1x256xf32>
    %78 = arith.addf %70, %77 : vector<1x256xf32>
    %cst_22 = arith.constant 8.000000e+00 : f32
    %79 = vector.broadcast %cst_22 : f32 to vector<1x256xf32>
    %80 = arith.mulf %78, %79 : vector<1x256xf32>
    %cst_23 = arith.constant 5.000000e-01 : f32
    %81 = vector.broadcast %cst_23 : f32 to vector<1x256xf32>
    %82 = arith.subf %80, %81 : vector<1x256xf32>
    %cst_24 = arith.constant 5.000000e-01 : f32
    %83 = vector.broadcast %cst_24 : f32 to vector<1x256xf32>
    %84 = arith.addf %76, %83 : vector<1x256xf32>
    %85 = math.absf %84 : vector<1x256xf32>
    %cst_25 = arith.constant 1.600000e+01 : f32
    %86 = vector.broadcast %cst_25 : f32 to vector<1x256xf32>
    %87 = arith.divf %85, %86 : vector<1x256xf32>
    %88 = math.floor %87 : vector<1x256xf32>
    %cst_26 = arith.constant 1.600000e+01 : f32
    %89 = vector.broadcast %cst_26 : f32 to vector<1x256xf32>
    %90 = arith.mulf %89, %88 : vector<1x256xf32>
    %91 = arith.subf %85, %90 : vector<1x256xf32>
    %cst_27 = arith.constant 5.000000e-01 : f32
    %92 = vector.broadcast %cst_27 : f32 to vector<1x256xf32>
    %93 = arith.mulf %88, %92 : vector<1x256xf32>
    %94 = math.floor %93 : vector<1x256xf32>
    %cst_28 = arith.constant 2.000000e+00 : f32
    %95 = vector.broadcast %cst_28 : f32 to vector<1x256xf32>
    %96 = arith.mulf %95, %94 : vector<1x256xf32>
    %97 = arith.subf %88, %96 : vector<1x256xf32>
    %cst_29 = arith.constant 5.000000e-01 : f32
    %98 = vector.broadcast %cst_29 : f32 to vector<1x256xf32>
    %99 = arith.cmpf ogt, %97, %98 : vector<1x256xf32>
    %cst_30 = arith.constant 1.600000e+01 : f32
    %100 = vector.broadcast %cst_30 : f32 to vector<1x256xf32>
    %101 = arith.subf %100, %91 : vector<1x256xf32>
    %cst_31 = arith.constant 5.000000e-01 : f32
    %102 = vector.broadcast %cst_31 : f32 to vector<1x256xf32>
    %103 = arith.subf %101, %102 : vector<1x256xf32>
    %cst_32 = arith.constant 5.000000e-01 : f32
    %104 = vector.broadcast %cst_32 : f32 to vector<1x256xf32>
    %105 = arith.subf %91, %104 : vector<1x256xf32>
    %106 = arith.select %99, %103, %105 : vector<1x256xi1>, vector<1x256xf32>
    %cst_33 = arith.constant 0.000000e+00 : f32
    %cst_34 = arith.constant 1.500000e+01 : f32
    %107 = vector.broadcast %cst_33 : f32 to vector<1x256xf32>
    %108 = arith.maximumf %107, %106 : vector<1x256xf32>
    %109 = vector.broadcast %cst_34 : f32 to vector<1x256xf32>
    %110 = arith.minimumf %109, %108 : vector<1x256xf32>
    %cst_35 = arith.constant 5.000000e-01 : f32
    %111 = vector.broadcast %cst_35 : f32 to vector<1x256xf32>
    %112 = arith.addf %82, %111 : vector<1x256xf32>
    %113 = math.absf %112 : vector<1x256xf32>
    %cst_36 = arith.constant 1.600000e+01 : f32
    %114 = vector.broadcast %cst_36 : f32 to vector<1x256xf32>
    %115 = arith.divf %113, %114 : vector<1x256xf32>
    %116 = math.floor %115 : vector<1x256xf32>
    %cst_37 = arith.constant 1.600000e+01 : f32
    %117 = vector.broadcast %cst_37 : f32 to vector<1x256xf32>
    %118 = arith.mulf %117, %116 : vector<1x256xf32>
    %119 = arith.subf %113, %118 : vector<1x256xf32>
    %cst_38 = arith.constant 5.000000e-01 : f32
    %120 = vector.broadcast %cst_38 : f32 to vector<1x256xf32>
    %121 = arith.mulf %116, %120 : vector<1x256xf32>
    %122 = math.floor %121 : vector<1x256xf32>
    %cst_39 = arith.constant 2.000000e+00 : f32
    %123 = vector.broadcast %cst_39 : f32 to vector<1x256xf32>
    %124 = arith.mulf %123, %122 : vector<1x256xf32>
    %125 = arith.subf %116, %124 : vector<1x256xf32>
    %cst_40 = arith.constant 5.000000e-01 : f32
    %126 = vector.broadcast %cst_40 : f32 to vector<1x256xf32>
    %127 = arith.cmpf ogt, %125, %126 : vector<1x256xf32>
    %cst_41 = arith.constant 1.600000e+01 : f32
    %128 = vector.broadcast %cst_41 : f32 to vector<1x256xf32>
    %129 = arith.subf %128, %119 : vector<1x256xf32>
    %cst_42 = arith.constant 5.000000e-01 : f32
    %130 = vector.broadcast %cst_42 : f32 to vector<1x256xf32>
    %131 = arith.subf %129, %130 : vector<1x256xf32>
    %cst_43 = arith.constant 5.000000e-01 : f32
    %132 = vector.broadcast %cst_43 : f32 to vector<1x256xf32>
    %133 = arith.subf %119, %132 : vector<1x256xf32>
    %134 = arith.select %127, %131, %133 : vector<1x256xi1>, vector<1x256xf32>
    %cst_44 = arith.constant 0.000000e+00 : f32
    %cst_45 = arith.constant 1.500000e+01 : f32
    %135 = vector.broadcast %cst_44 : f32 to vector<1x256xf32>
    %136 = arith.maximumf %135, %134 : vector<1x256xf32>
    %137 = vector.broadcast %cst_45 : f32 to vector<1x256xf32>
    %138 = arith.minimumf %137, %136 : vector<1x256xf32>
    %139 = math.floor %110 : vector<1x256xf32>
    %140 = math.floor %138 : vector<1x256xf32>
    %141 = arith.subf %110, %139 : vector<1x256xf32>
    %142 = arith.subf %138, %140 : vector<1x256xf32>
    %cst_46 = arith.constant 1.000000e+00 : f32
    %143 = vector.broadcast %cst_46 : f32 to vector<1x256xf32>
    %144 = arith.subf %143, %141 : vector<1x256xf32>
    %cst_47 = arith.constant 1.000000e+00 : f32
    %145 = vector.broadcast %cst_47 : f32 to vector<1x256xf32>
    %146 = arith.subf %145, %142 : vector<1x256xf32>
    %cst_48 = arith.constant 1.000000e+00 : f32
    %147 = vector.broadcast %cst_48 : f32 to vector<1x256xf32>
    %148 = arith.addf %139, %147 : vector<1x256xf32>
    %cst_49 = arith.constant 1.500000e+01 : f32
    %149 = vector.broadcast %cst_49 : f32 to vector<1x256xf32>
    %150 = arith.cmpf ole, %148, %149 : vector<1x256xf32>
    %cst_50 = arith.constant 0.000000e+00 : f32
    %151 = vector.broadcast %cst_50 : f32 to vector<1x256xf32>
    %152 = arith.select %150, %141, %151 : vector<1x256xi1>, vector<1x256xf32>
    %cst_51 = arith.constant 1.000000e+00 : f32
    %153 = vector.broadcast %cst_51 : f32 to vector<1x256xf32>
    %154 = arith.addf %140, %153 : vector<1x256xf32>
    %cst_52 = arith.constant 1.500000e+01 : f32
    %155 = vector.broadcast %cst_52 : f32 to vector<1x256xf32>
    %156 = arith.cmpf ole, %154, %155 : vector<1x256xf32>
    %cst_53 = arith.constant 0.000000e+00 : f32
    %157 = vector.broadcast %cst_53 : f32 to vector<1x256xf32>
    %158 = arith.select %156, %142, %157 : vector<1x256xi1>, vector<1x256xf32>
    %cst_54 = arith.constant 1.000000e+00 : f32
    %159 = vector.broadcast %cst_54 : f32 to vector<1x256xf32>
    %160 = arith.addf %139, %159 : vector<1x256xf32>
    %cst_55 = arith.constant 1.500000e+01 : f32
    %161 = vector.broadcast %cst_55 : f32 to vector<1x256xf32>
    %162 = arith.minimumf %160, %161 : vector<1x256xf32>
    %cst_56 = arith.constant 1.000000e+00 : f32
    %163 = vector.broadcast %cst_56 : f32 to vector<1x256xf32>
    %164 = arith.addf %140, %163 : vector<1x256xf32>
    %cst_57 = arith.constant 1.500000e+01 : f32
    %165 = vector.broadcast %cst_57 : f32 to vector<1x256xf32>
    %166 = arith.minimumf %164, %165 : vector<1x256xf32>
    %c1_i32 = arith.constant 1 : i32
    %167 = arith.muli %arg0, %c1_i32 : i32
    %168 = arith.addi %167, %arg1 : i32
    %169 = arith.index_cast %168 : i32 to index
    %170 = memref.load %arg2[%169] : memref<2xi32, #tpu.memory_space<smem>>
    %c1_i32_58 = arith.constant 1 : i32
    %171 = arith.muli %arg0, %c1_i32_58 : i32
    %172 = arith.addi %171, %arg1 : i32
    %173 = arith.index_cast %172 : i32 to index
    %174 = memref.load %arg3[%173] : memref<2xi32, #tpu.memory_space<smem>>
    %c1_i32_59 = arith.constant 1 : i32
    %175 = arith.addi %174, %c1_i32_59 : i32
    %cst_60 = arith.constant 0.000000e+00 : f32
    %176 = vector.broadcast %cst_60 : f32 to vector<4x256xf32>
    %177 = arith.subi %175, %170 : i32
    %178 = arith.addi %170, %177 : i32
    %c1_i32_61 = arith.constant 1 : i32
    %179 = scf.for %arg9 = %170 to %178 step %c1_i32_61 iter_args(%arg10 = %176) -> (vector<4x256xf32>)  : i32 {
      %c0_65 = arith.constant 0 : index
      %182 = arith.index_cast %arg9 : i32 to index
      %c0_66 = arith.constant 0 : index
      %c0_67 = arith.constant 0 : index
      %183 = vector.load %arg7[%c0_65, %182, %c0_66, %c0_67] : memref<1x1x4x256xf32, #tpu.memory_space<vmem>>, vector<1x1x4x256xf32>
      %184 = vector.shape_cast %183 : vector<1x1x4x256xf32> to vector<4x256xf32>
      %c256_i32_68 = arith.constant 256 : i32
      %185 = arith.muli %arg9, %c256_i32_68 : i32
      %186 = tpu.iota {dimensions = array<i32: 0>} : vector<256x1xi32>
      %187 = vector.broadcast %185 : i32 to vector<256x1xi32>
      %188 = arith.addi %187, %186 : vector<256x1xi32>
      %189 = arith.sitofp %188 : vector<256x1xi32> to vector<256x1xf32>
      %cst_69 = arith.constant 5.000000e-01 : f32
      %190 = vector.broadcast %cst_69 : f32 to vector<256x1xf32>
      %191 = arith.addf %189, %190 : vector<256x1xf32>
      %cst_70 = arith.constant 1.600000e+01 : f32
      %192 = vector.broadcast %cst_70 : f32 to vector<256x1xf32>
      %193 = arith.divf %191, %192 : vector<256x1xf32>
      %194 = math.floor %193 : vector<256x1xf32>
      %cst_71 = arith.constant 1.600000e+01 : f32
      %195 = vector.broadcast %cst_71 : f32 to vector<256x1xf32>
      %196 = arith.mulf %194, %195 : vector<256x1xf32>
      %197 = arith.subf %189, %196 : vector<256x1xf32>
      %198 = vector.broadcast %194 : vector<256x1xf32> to vector<256x256xf32>
      %199 = vector.broadcast %140 : vector<1x256xf32> to vector<256x256xf32>
      %200 = arith.cmpf oeq, %198, %199 : vector<256x256xf32>
      %cst_72 = arith.constant 0.000000e+00 : f32
      %201 = vector.shape_cast %146 : vector<1x256xf32> to vector<1x256xf32>
      %202 = vector.broadcast %201 : vector<1x256xf32> to vector<256x256xf32>
      %203 = vector.broadcast %cst_72 : f32 to vector<256x256xf32>
      %204 = arith.select %200, %202, %203 : vector<256x256xi1>, vector<256x256xf32>
      %205 = vector.broadcast %194 : vector<256x1xf32> to vector<256x256xf32>
      %206 = vector.broadcast %166 : vector<1x256xf32> to vector<256x256xf32>
      %207 = arith.cmpf oeq, %205, %206 : vector<256x256xf32>
      %cst_73 = arith.constant 0.000000e+00 : f32
      %208 = vector.shape_cast %158 : vector<1x256xf32> to vector<1x256xf32>
      %209 = vector.broadcast %208 : vector<1x256xf32> to vector<256x256xf32>
      %210 = vector.broadcast %cst_73 : f32 to vector<256x256xf32>
      %211 = arith.select %207, %209, %210 : vector<256x256xi1>, vector<256x256xf32>
      %212 = arith.addf %204, %211 : vector<256x256xf32>
      %213 = vector.broadcast %197 : vector<256x1xf32> to vector<256x256xf32>
      %214 = vector.broadcast %139 : vector<1x256xf32> to vector<256x256xf32>
      %215 = arith.cmpf oeq, %213, %214 : vector<256x256xf32>
      %cst_74 = arith.constant 0.000000e+00 : f32
      %216 = vector.shape_cast %144 : vector<1x256xf32> to vector<1x256xf32>
      %217 = vector.broadcast %216 : vector<1x256xf32> to vector<256x256xf32>
      %218 = vector.broadcast %cst_74 : f32 to vector<256x256xf32>
      %219 = arith.select %215, %217, %218 : vector<256x256xi1>, vector<256x256xf32>
      %220 = vector.broadcast %197 : vector<256x1xf32> to vector<256x256xf32>
      %221 = vector.broadcast %162 : vector<1x256xf32> to vector<256x256xf32>
      %222 = arith.cmpf oeq, %220, %221 : vector<256x256xf32>
      %cst_75 = arith.constant 0.000000e+00 : f32
      %223 = vector.shape_cast %152 : vector<1x256xf32> to vector<1x256xf32>
      %224 = vector.broadcast %223 : vector<1x256xf32> to vector<256x256xf32>
      %225 = vector.broadcast %cst_75 : f32 to vector<256x256xf32>
      %226 = arith.select %222, %224, %225 : vector<256x256xi1>, vector<256x256xf32>
      %227 = arith.addf %219, %226 : vector<256x256xf32>
      %228 = arith.mulf %212, %227 : vector<256x256xf32>
      %229 = arith.truncf %228 : vector<256x256xf32> to vector<256x256xbf16>
      %230 = arith.truncf %184 : vector<4x256xf32> to vector<4x256xbf16>
      %cst_76 = arith.constant dense<0.000000e+00> : vector<4x256xf32>
      %231 = tpu.matmul %230, %229, %cst_76 {dimension_numbers = #tpu.dot_dimension_numbers<[1], [0], [0], [1], [0, 0, 1, 1], [], []>} : vector<4x256xbf16>, vector<256x256xbf16>, vector<4x256xf32> -> vector<4x256xf32>
      %232 = arith.addf %arg10, %231 : vector<4x256xf32>
      scf.yield %232 : vector<4x256xf32>
    }
    %180 = vector.shape_cast %179 : vector<4x256xf32> to vector<1x4x256xf32>
    %c0_62 = arith.constant 0 : index
    %c0_63 = arith.constant 0 : index
    %c0_64 = arith.constant 0 : index
    %181 = vector.load %arg8[%c0_62, %c0_63, %c0_64] : memref<1x4x256xf32, #tpu.memory_space<vmem>>, vector<1x4x256xf32>
    tpu.vector_store %arg8[%c0_62, %c0_63, %c0_64], %180 {strides = array<i32>} : memref<1x4x256xf32, #tpu.memory_space<vmem>>, vector<1x4x256xf32>,
    return
  }
  func.func @transform_0(%arg0: i32, %arg1: i32, %arg2: memref<2xi32, #tpu.memory_space<smem>>, %arg3: memref<2xi32, #tpu.memory_space<smem>>) -> (i32, i32, i32) {
    %c0_i32 = arith.constant 0 : i32
    %c0_i32_0 = arith.constant 0 : i32
    %c0_i32_1 = arith.constant 0 : i32
    return %arg0, %c0_i32, %c0_i32_0 : i32, i32, i32
  }
  func.func @transform_1(%arg0: i32, %arg1: i32, %arg2: memref<2xi32, #tpu.memory_space<smem>>, %arg3: memref<2xi32, #tpu.memory_space<smem>>) -> (i32, i32) {
    %c0_i32 = arith.constant 0 : i32
    %c0_i32_0 = arith.constant 0 : i32
    %c0_i32_1 = arith.constant 0 : i32
    return %c0_i32, %c0_i32_0 : i32, i32
  }
  func.func @transform_2(%arg0: i32, %arg1: i32, %arg2: memref<2xi32, #tpu.memory_space<smem>>, %arg3: memref<2xi32, #tpu.memory_space<smem>>) -> (i32, i32, i32) {
    %c0_i32 = arith.constant 0 : i32
    %c0_i32_0 = arith.constant 0 : i32
    %c0_i32_1 = arith.constant 0 : i32
    return %arg0, %c0_i32, %c0_i32_0 : i32, i32, i32
  }
  func.func @transform_3(%arg0: i32, %arg1: i32, %arg2: memref<2xi32, #tpu.memory_space<smem>>, %arg3: memref<2xi32, #tpu.memory_space<smem>>) -> (i32, i32, i32, i32) {
    %c0_i32 = arith.constant 0 : i32
    %c0_i32_0 = arith.constant 0 : i32
    %c0_i32_1 = arith.constant 0 : i32
    %c0_i32_2 = arith.constant 0 : i32
    return %arg0, %c0_i32, %c0_i32_0, %c0_i32_1 : i32, i32, i32, i32
  }
  func.func @transform_4(%arg0: i32, %arg1: i32, %arg2: memref<2xi32, #tpu.memory_space<smem>>, %arg3: memref<2xi32, #tpu.memory_space<smem>>) -> (i32, i32, i32) {
    %c0_i32 = arith.constant 0 : i32
    %c0_i32_0 = arith.constant 0 : i32
    return %arg0, %c0_i32, %arg1 : i32, i32, i32
  }
}

</mosaic_0001>

<bundles_post_ra>
// kernel: tpu_custom_call.1
= control target key start
LH: loop header
LB: loop body
LE: loop exit
PB: predicated region body
PF: predicated region fallthrough
CT: control target
= control target key end

     0   :  { %s3272_s0 = inlined_call_operand.vmem [shape: s32[2], index: 0, kind: input, shape index: {}]   ;;  %s3273_s2 = inlined_call_operand.vmem [shape: f32[2,2,3], index: 2, kind: input, shape index: {}]   ;;  %s3274_s3 = inlined_call_operand.vmem [shape: f32[25,2], index: 3, kind: input, shape index: {}]   ;;  %s3275_s4 = inlined_call_operand.vmem [shape: f32[2,25,1], index: 4, kind: input, shape index: {}]   ;;  %s3276_s5 = inlined_call_operand.vmem [shape: f32[2,1,4,256], index: 5, kind: input, shape index: {}]   ;;  %s3277_s6 = inlined_call_operand.hbm [shape: f32[2,4,256], index: 6, kind: output, shape index: {}]   ;;  %s3278_s1 = inlined_call_operand.vmem [shape: s32[2], index: 1, kind: input, shape index: {}]  }
   0x1   :  { %s11_s23 = sshll.u32 %s3272_s0, 4  ;;  %s15_s26 = sshll.u32 %s3278_s1, 4  ;;  %s12_s23 = int_to_ptr.vmem [resolvable:$true] %s11_s23  ;;  %s16_s26 = int_to_ptr.vmem [resolvable:$true] %s15_s26 }
   0x2   :  { %s1952_s27 = scalar_lea.vmem %s12_s23, 16  ;;  %p1957_p1 = scmp.lt.s32.totalorder %s12_s23, %s12_s23 }
   0x3   :  { %p1953_p0 = scmp.ne.s32.totalorder %s12_s23, %s1952_s27  ;;  %p1958_p2 = scmp.lt.s32.totalorder %s1952_s27, %s1952_s27 }
   0x5   :  { %p1959_p3 = por %p1958_p2, %p1957_p1 }
   0x7   :  { %p1960_p4 = pnand %p1959_p3, %p1953_p0 }
   0x9   :  { %1963 = shalt.err (!%p1960_p4)  }
   0xa   :  { %s2098_s28 = smov [#allocation3]   ;;  %s1964_s29 = scalar_lea.vmem %s16_s26, 16 }
   0xb   :  { %14 = dma.vmem_to_smem %s12_s23, 16, %s2098_s28, [#allocation2] }
   0xc   :  { %p1965_p5 = scmp.ne.s32.totalorder %s16_s26, %s1964_s29  ;;  %p1969_p6 = scmp.lt.s32.totalorder %s16_s26, %s16_s26 }
   0xd   :  { %p1970_p7 = scmp.lt.s32.totalorder %s1964_s29, %s1964_s29 }
   0xf   :  { %p1971_p8 = por %p1970_p7, %p1969_p6 }
  0x11   :  { %p1972_p9 = pnand %p1971_p8, %p1965_p5 }
  0x13   :  { %1975 = shalt.err (!%p1972_p9)  }
  0x14   :  { %s2099_s0 = smov [#allocation4]  }
  0x15   :  { %18 = dma.vmem_to_smem %s16_s26, 16, %s2099_s0, [#allocation2] }
  0x16   :  { %2048 = dma.done.wait [#allocation2], 32 }
  0x17   :  { %2049 = vsyncadd [#allocation2], 4294967264 }
  0x18   :  { %20 = sfence }
  0x19   :  { %21 = vsyncpa [#allocation6], 0 }
  0x1a   :  { %23 = vsyncpa [#allocation6 + $0x1], 0  ;;  %s2145_s1 = smov 0   ;;  %s2147_s30 = smov 0  }
  0x1b   :  { %s2149_s7 = smov 0   ;;  %s2151_s8 = smov 0  }
  0x1c   :  { %s2153_s9 = smov 0   ;;  %s2155_s10 = smov 0  }
  0x1d LB: > { %s1796_s11 = sadd.s32 4294967295, %s2076_s10   ;;  %s1797_s12 = sadd.s32 4294967294, %s2076_s10   ;;  %s2076_s10 = sphi %s2155_s10, %s29_s10   ;;  %s2072_s9 = sphi %s2153_s9, %s3292_s9   ;;  %s2068_s8 = sphi %s2151_s8, %s3291_s8   ;;  %s2064_s7 = sphi %s2149_s7, %s3290_s7   ;;  %s2060_s30 = sphi %s2147_s30, %s3289_s30   ;;  %s2056_s1 = sphi %s2145_s1, %s3288_s1  }
  0x1e   : > { %s41_s13 = sadd.s32 1, %s2072_s9  ;;  %s149_s14 = sadd.s32 1, %s2064_s7 }
  0x1f   : > { %p43_p10 = scmp.ge.s32.totalorder %s41_s13, 2  ;;  %p159_p11 = scmp.ne.s32.totalorder %s2064_s7, %s2060_s30 }
  0x20   : > { %p160_p12 = scmp.eq.s32.totalorder %s1796_s11, 1  ;;  %p165_p13 = scmp.ne.s32.totalorder %s2060_s30, %s2056_s1 }
  0x21   : > { %s3294_s13 = smov (%p43_p10, %s41_s13), 0  ;;  %p166_p1 = scmp.eq.s32.totalorder %s1797_s12, 1 }
  0x22   : > { %p2185_p0 = por %p160_p12, %p159_p11  ;;  %s144_s16 = ssub.s32 %s2072_s9, %s3294_s13 }
  0x23   : > { %p1800_p2 = scmp.ge.s32.totalorder %s2076_s10, 1  ;;  %p147_p3 = scmp.eq.s32.totalorder %s144_s16, 0 }
  0x24   : > { %p2192_p4 = por %p166_p1, %p165_p13  ;;  %p210_p5 = scmp.lt.s32.totalorder %s2076_s10, 3 }
  0x25   : > { %s2198_s18 = scalar_select %p147_p3, %s2064_s7, %s149_s14  }
  0x26   : > { %p211_p6 = pnand %p1800_p2, %p210_p5 }
  0x27   : > { %v315_v0 = vld [vmem:[%s3274_s3] sm:$0xff] (!%p211_p6)  ;;  %p245_p7 = scmp.lt.s32.totalorder (!%p211_p6), %s2068_s8, 1  ;;  %v2100_v1 = vmov (!%p211_p6), 1   ;;  %v2101_v2 = vmov (!%p211_p6), 0   ;;  %v316_v3 = vld [vmem:[%s3274_s3 + $0x8] sm:$0xff] (!%p211_p6)  ;;  %v317_v4 = vld [vmem:[%s3274_s3 + $0x10] sm:$0xff] (!%p211_p6)  ;;  %v3279_v12 = vlaneseq (!%p211_p6) }
  0x28   : > { %214 = sbr.rel (%p211_p6) target bundleno = 767 (0x2ff), region = 36  ;;  %1930 = vset.pattern.permute.xlu1 (!%p211_p6), %v2100_v1  ;;  %1929 = vset.pattern.permute.xlu0 (!%p211_p6), %v2101_v2  ;;  %v318_v5 = vld [vmem:[%s3274_s3 + $0x18] sm:$0x1] (!%p211_p6)  ;;  %v2102_v11 = vmov (!%p211_p6), 2   ;;  %s242_s25 = sand.u32 (!%p211_p6), 1, %s2060_s30   ;;  %vm469_vm0 = vcmask (!%p211_p6), 1040384  }
  0x29   : > { %360 = vperm.xlu1 (!%p211_p6), %1930, %v315_v0   ;;  %325 = vperm.xlu0 (!%p211_p6), %1929, %v315_v0   ;;  %v262_v13 = vand.u32 (!%p211_p6), 127, %v3279_v12  ;;  %s2232_s26 = sshll.u32 (!%p211_p6), %s242_s25, 3  ;;  %s2235_s28 = sld [smem:[#allocation3 + %s2068_s8]] (!%p211_p6)  }
  0x2b   : > { %v263_v14 = vadd.s32 (!%p211_p6), 128, %v262_v13  ;;  %v267_v15 = vcvt.s32.f32 (!%p211_p6), %v262_v13 }
  0x2d   : > { %364 = vperm.xlu1 (!%p211_p6), %1930, %v316_v3   ;;  %330 = vperm.xlu0 (!%p211_p6), %1929, %v316_v3   ;;  %v268_v16 = vcvt.s32.f32 (!%p211_p6), %v263_v14  ;;  %v269_v17 = vadd.f32 (!%p211_p6), 0.5, %v267_v15 }
  0x2f   : > { %s246_s21 = scalar_select %p245_p7, %s2068_s8, 1  ;;  %v270_v18 = vadd.f32 0.5, %v268_v16  ;;  %v272_v19 = vmul.f32 0.0625, %v269_v17 }
  0x31   : > { %s1826_s24 = sshll.u32 %s246_s21, 3  ;;  %s1825_s0 = sshll.u32 %s246_s21, 5  ;;  %368 = vperm.xlu1 %1930, %v317_v4   ;;  %335 = vperm.xlu0 %1929, %v317_v4   ;;  %v273_v20 = vmul.f32 0.0625, %v270_v18  ;;  %v274_v21 = vfloor.f32 %v272_v19 }
  0x32   : > { %s2211_s27 = scalar_lea.vmem %s3276_s5, %s1826_s24  ;;  %s253_s19 = scalar_lea.vmem %s3275_s4, %s1825_s0 }
  0x33   : > { %v319_v6 = vld [vmem:[%s253_s19] sm:$0xff]  ;;  %v320_v7 = vld [vmem:[%s253_s19 + $0x8] sm:$0xff]  ;;  %s1802_s20 = sshll.u32 %s246_s21, 1  ;;  %v321_v8 = vld [vmem:[%s253_s19 + $0x10] sm:$0xff]  ;;  %s2227_s21 = sld [smem:[#allocation4 + %s2068_s8]]  ;;  %v275_v22 = vfloor.f32 %v273_v20  ;;  %v276_v23 = vmul.f32 16.0, %v274_v21 }
  0x34   : > { %v322_v9 = vld [vmem:[%s253_s19 + $0x18] sm:$0x1]  ;;  %s248_s24 = scalar_lea.vmem %s3273_s2, %s1802_s20  ;;  %v287_v27 = vmul.f32 2.0, %v274_v21  ;;  %s244_s0 = scalar_lea.vmem [#allocation5], %s2232_s26 }
  0x35   : > { %372 = vperm.xlu1 %1930, %v318_v5   ;;  %340 = vperm.xlu0 %1929, %v318_v5   ;;  %v293_v10 = vld [vmem:[%s248_s24] sm:$0x3]  ;;  %v277_v24 = vmul.f32 16.0, %v275_v22  ;;  %v278_v25 = vsub.f32 %v267_v15, %v276_v23  ;;  %v288_v28 = vmul.f32 2.0, %v275_v22 }
  0x36   : > { %v289_v31 = vmul.f32 0.06666667, %v287_v27 }
  0x37   : > { %v279_v26 = vsub.f32 %v268_v16, %v277_v24  ;;  %v280_v29 = vmul.f32 2.0, %v278_v25  ;;  %v290_v32 = vmul.f32 0.06666667, %v288_v28 }
  0x38   : > { %v2238_v35 = vadd.f32 -1.0, %v289_v31 }
  0x39   : > { %1931 = vset.pattern.permute.xlu1 %v2101_v2  ;;  %441 = vperm.xlu0 %1929, %v319_v6   ;;  %s547_s29 = sadd.s32 1, %s2227_s21  ;;  %v281_v30 = vmul.f32 2.0, %v279_v26  ;;  %v283_v33 = vmul.f32 0.06666667, %v280_v29  ;;  %v2240_v36 = vadd.f32 -1.0, %v290_v32 }
  0x3a   : > { %446 = vperm.xlu1 %1931, %v320_v7   ;;  %p1745_p8 = scmp.ge.s32.totalorder %s2235_s28, %s547_s29 }
  0x3b   : > { %v284_v34 = vmul.f32 0.06666667, %v281_v30  ;;  %v2242_v37 = vadd.f32 -1.0, %v283_v33 }
  0x3d   : > { %451 = vperm.xlu0 %1929, %v321_v8   ;;  %v2244_v38 = vadd.f32 -1.0, %v284_v34 }
  0x3e   : > { %456 = vperm.xlu1 %1931, %v322_v9  }
  0x41   : > { %296 = vperm.xlu0 %1929, %v293_v10  }
  0x42   : > { %1932 = vset.pattern.permute.xlu1 %v2100_v1 }
  0x43   : > { %302 = vperm.xlu1 %1932, %v293_v10  }
  0x45   : > { %1933 = vset.pattern.permute.xlu0 %v2102_v11 }
  0x46   : > { %310 = vperm.xlu0 %1933, %v293_v10  }
  0x4a   : > { %1934 = vset.pattern.permute.xlu0 %v2101_v2 }
  0xa8   : > { %v361_v39 = vpop.permute.xlu1 %360  ;;  %v326_v40 = vpop.permute.xlu0 %325 }
  0xa9   : > { %v375_v41 = vsub.f32 %v2238_v35, %v361_v39  ;;  %v376_v42 = vsub.f32 %v2240_v36, %v361_v39  ;;  %v343_v43 = vsub.f32 %v2242_v37, %v326_v40  ;;  %v344_v44 = vsub.f32 %v2244_v38, %v326_v40 }
  0xab   : > { %v383_v45 = vand.u32 2147483647, %v375_v41  ;;  %v384_v46 = vand.u32 2147483647, %v376_v42  ;;  %v351_v47 = vand.u32 2147483647, %v343_v43 }
  0xac   : > { %v352_v48 = vand.u32 2147483647, %v344_v44  ;;  %v365_v49 = vpop.permute.xlu1 %364  ;;  %v331_v50 = vpop.permute.xlu0 %330 }
  0xad   : > { %v2250_v51 = vadd.f32 %v383_v45, %v351_v47  ;;  %v377_v52 = vsub.f32 %v2238_v35, %v365_v49  ;;  %v378_v53 = vsub.f32 %v2240_v36, %v365_v49  ;;  %v345_v54 = vsub.f32 %v2242_v37, %v331_v50 }
  0xae   : > { %v2255_v55 = vadd.f32 %v384_v46, %v352_v48  ;;  %v346_v56 = vsub.f32 %v2244_v38, %v331_v50 }
  0xaf   : > { %v407_v57 = vadd.f32 1e-05, %v2250_v51  ;;  %v385_v58 = vand.u32 2147483647, %v377_v52  ;;  %v386_v59 = vand.u32 2147483647, %v378_v53  ;;  %v399_v49 = vmul.f32 %v2250_v51, %v2250_v51 }
  0xb0   : > { %v408_v60 = vadd.f32 1e-05, %v2255_v55  ;;  %v353_v61 = vand.u32 2147483647, %v345_v54  ;;  %v354_v62 = vand.u32 2147483647, %v346_v56  ;;  %v369_v63 = vpop.permute.xlu1 %368  ;;  %v336_v0 = vpop.permute.xlu0 %335  ;;  %v400_v54 = vmul.f32 %v2255_v55, %v2255_v55 }
  0xb1   : > { %v379_v1 = vsub.f32 %v2238_v35, %v369_v63  ;;  %v380_v2 = vsub.f32 %v2240_v36, %v369_v63  ;;  %v347_v3 = vsub.f32 %v2242_v37, %v336_v0  ;;  %v348_v6 = vsub.f32 %v2244_v38, %v336_v0 }
  0xb2   : > { %v393_v4 = vadd.f32 %v385_v58, %v353_v61  ;;  %v394_v5 = vadd.f32 %v386_v59, %v354_v62  ;;  %1935 = vlog2.f32 %v407_v57 }
  0xb3   : > { %v387_v7 = vand.u32 2147483647, %v379_v1  ;;  %v388_v8 = vand.u32 2147483647, %v380_v2  ;;  %v355_v9 = vand.u32 2147483647, %v347_v3  ;;  %1937 = vlog2.f32 %v408_v60 }
  0xb4   : > { %v409_v10 = vadd.f32 1e-05, %v393_v4  ;;  %v410_v11 = vadd.f32 1e-05, %v394_v5  ;;  %v356_v13 = vand.u32 2147483647, %v348_v6  ;;  %v373_v14 = vpop.permute.xlu1 %372  ;;  %v341_v15 = vpop.permute.xlu0 %340  ;;  %v401_v42 = vmul.f32 %v393_v4, %v393_v4 }
  0xb5   : > { %v395_v16 = vadd.f32 %v387_v7, %v355_v9  ;;  %v381_v17 = vsub.f32 %v2238_v35, %v373_v14  ;;  %v382_v18 = vsub.f32 %v2240_v36, %v373_v14  ;;  %v349_v19 = vsub.f32 %v2242_v37, %v341_v15 }
  0xb6   : > { %1939 = vlog2.f32 %v409_v10  ;;  %v396_v20 = vadd.f32 %v388_v8, %v356_v13  ;;  %v350_v21 = vsub.f32 %v2244_v38, %v341_v15  ;;  %v402_v47 = vmul.f32 %v394_v5, %v394_v5 }
  0xb7   : > { %1941 = vlog2.f32 %v410_v11  ;;  %v411_v22 = vadd.f32 1e-05, %v395_v16  ;;  %v389_v23 = vand.u32 2147483647, %v381_v17  ;;  %v390_v24 = vand.u32 2147483647, %v382_v18 }
  0xb8   : > { %v412_v25 = vadd.f32 1e-05, %v396_v20  ;;  %v357_v26 = vand.u32 2147483647, %v349_v19  ;;  %v358_v27 = vand.u32 2147483647, %v350_v21  ;;  %v442_v46 = vpop.permute.xlu0 %441  ;;  %v403_v52 = vmul.f32 %v395_v16, %v395_v16 }
  0xb9   : > { %1943 = vlog2.f32 %v411_v22  ;;  %v447_v57 = vpop.permute.xlu1 %446  ;;  %v404_v58 = vmul.f32 %v396_v20, %v396_v20 }
  0xba   : > { %1945 = vlog2.f32 %v412_v25  ;;  %v397_v28 = vadd.f32 %v389_v23, %v357_v26  ;;  %v398_v29 = vadd.f32 %v390_v24, %v358_v27 }
  0xbc   : > { %v413_v30 = vadd.f32 1e-05, %v397_v28  ;;  %v414_v31 = vadd.f32 1e-05, %v398_v29  ;;  %v1936_v32 = vpop.eup %1935  ;;  %v452_v4 = vpop.permute.xlu0 %451  ;;  %v405_v51 = vmul.f32 %v397_v28, %v397_v28  ;;  %v406_v8 = vmul.f32 %v398_v29, %v398_v29 }
  0xbd   : > { %v1938_v33 = vpop.eup %1937  ;;  %v416_v41 = vmul.f32 0.6931472, %v1936_v32  ;;  %v457_v13 = vpop.permute.xlu1 %456 }
  0xbe   : > { %1947 = vlog2.f32 %v413_v30  ;;  %v418_v45 = vmul.f32 0.6931472, %v1938_v33 }
  0xbf   : > { %1949 = vlog2.f32 %v414_v31  ;;  %v431_v60 = vmul.f32 %v416_v41, %v399_v49 }
  0xc0   : > { %v1940_v34 = vpop.eup %1939  ;;  %v432_v62 = vmul.f32 %v418_v45, %v400_v54  ;;  %v297_v28 = vpop.permute.xlu0 %296 }
  0xc1   : > { %v1942_v39 = vpop.eup %1941  ;;  %v420_v40 = vmul.f32 0.6931472, %v1940_v34  ;;  %v459_v6 = vmul.f32 %v442_v46, %v431_v60  ;;  %v299_v33 = vmul.f32 %v2242_v37, %v297_v28 }
  0xc2   : > { %v422_v43 = vmul.f32 0.6931472, %v1942_v39  ;;  %v460_v55 = vmul.f32 %v442_v46, %v432_v62  ;;  %v303_v25 = vpop.permute.xlu1 %302  ;;  %v300_v39 = vmul.f32 %v2244_v38, %v297_v28 }
  0xc3   : > { %v1944_v44 = vpop.eup %1943  ;;  %v433_v50 = vmul.f32 %v420_v40, %v401_v42  ;;  %v305_v30 = vmul.f32 %v2238_v35, %v303_v25  ;;  %v306_v32 = vmul.f32 %v2240_v36, %v303_v25 }
  0xc4   : > { %v1946_v48 = vpop.eup %1945  ;;  %v424_v53 = vmul.f32 0.6931472, %v1944_v44  ;;  %v434_v56 = vmul.f32 %v422_v43, %v402_v47 }
  0xc5   : > { %v426_v59 = vmul.f32 0.6931472, %v1946_v48  ;;  %v461_v1 = vmul.f32 %v447_v57, %v433_v50  ;;  %v307_v41 = vadd.f32 %v305_v30, %v299_v33  ;;  %v308_v43 = vadd.f32 %v306_v32, %v300_v39  ;;  %v311_v45 = vpop.permute.xlu0 %310 }
  0xc6   : > { %v435_v61 = vmul.f32 %v424_v53, %v403_v52  ;;  %v462_v3 = vmul.f32 %v447_v57, %v434_v56 }
  0xc7   : > { %v436_v63 = vmul.f32 %v426_v59, %v404_v58  ;;  %v467_v14 = vadd.f32 %v461_v1, %v459_v6  ;;  %v313_v49 = vadd.f32 %v311_v45, %v307_v41  ;;  %v314_v35 = vadd.f32 %v311_v45, %v308_v43 }
  0xc8   : > { %v1948_v0 = vpop.eup %1947  ;;  %v463_v7 = vmul.f32 %v452_v4, %v435_v61  ;;  %v478_v16 = vadd.f32 %v462_v3, %v460_v55  ;;  %v2308_v41 = vmov 0.0   ;;  %v2312_v43 = vmov (!%p1745_p8), 0.0  }
  0xc9   : > { %v1950_v2 = vpop.eup %1949  ;;  %v428_v5 = vmul.f32 0.6931472, %v1948_v0  ;;  %v464_v10 = vmul.f32 %v452_v4, %v436_v63 }
  0xca   : > { %v430_v9 = vmul.f32 0.6931472, %v1950_v2  ;;  %v468_v18 = vadd.f32 %v467_v14, %v463_v7 }
  0xcb   : > { %v437_v11 = vmul.f32 %v428_v5, %v405_v51  ;;  %v479_v20 = vadd.f32 %v478_v16, %v464_v10 }
  0xcc   : > { %v438_v15 = vmul.f32 %v430_v9, %v406_v8 }
  0xcd   : > { %v465_v17 = vmul.f32 %v457_v13, %v437_v11 }
  0xce   : > { %v466_v19 = vmul.f32 %v457_v13, %v438_v15 }
  0xcf   : > { %v470_v21 = vsel %vm469_vm0, %v465_v17, 0.0 }
  0xd0   : > { %v471_v22 = vadd.f32 %v470_v21, %v468_v18  ;;  %v480_v23 = vsel %vm469_vm0, %v466_v19, 0.0 }
  0xd1   : > { %v481_v24 = vadd.f32 %v480_v23, %v479_v20 }
  0xd2   : > { %v472_v26 = vrot.slane %v471_v22, 4 }
  0xd3   : > { %v482_v27 = vrot.slane %v481_v24, 4 }
  0xd4   : > { %v473_v29 = vadd.f32 %v472_v26, %v471_v22 }
  0xd5   : > { %v483_v31 = vadd.f32 %v482_v27, %v481_v24 }
  0xd6   : > { %v474_v34 = vrot.slane %v473_v29, 2 }
  0xd7   : > { %v484_v40 = vrot.slane %v483_v31, 2 }
  0xd8   : > { %v475_v42 = vadd.f32 %v474_v34, %v473_v29 }
  0xd9   : > { %v485_v44 = vadd.f32 %v484_v40, %v483_v31 }
  0xda   : > { %v476_v46 = vrot.slane %v475_v42, 1 }
  0xdb   : > { %v486_v47 = vrot.slane %v485_v44, 1 }
  0xdc   : > { %v477_v48 = vadd.f32 %v476_v46, %v475_v42  ;;  %v2310_v42 = vmov 0.0  }
  0xdd   : > { %v487_v50 = vadd.f32 %v486_v47, %v485_v44  ;;  %v2314_v44 = vmov (!%p1745_p8), 0.0  }
  0xde   : > { %v488_v52 = vadd.f32 %v477_v48, %v313_v49 }
  0xdf   : > { %v489_v53 = vadd.f32 %v487_v50, %v314_v35 }
  0xe0   : > { %v490_v36 = vadd.f32 1.0, %v488_v52 }
  0xe1   : > { %v491_v54 = vadd.f32 1.0, %v489_v53 }
  0xe2   : > { %v492_v37 = vmul.f32 8.0, %v490_v36 }
  0xe3   : > { %v493_v56 = vmul.f32 8.0, %v491_v54 }
  0xe4   : > { %v1811_v57 = vadd.f32 -0.5, %v492_v37 }
  0xe5   : > { %v1812_v38 = vadd.f32 -0.5, %v493_v56 }
  0xe6   : > { %v496_v58 = vadd.f32 0.5, %v1811_v57 }
  0xe7   : > { %v497_v59 = vadd.f32 0.5, %v1812_v38 }
  0xe8   : > { %v498_v60 = vand.u32 2147483647, %v496_v58 }
  0xe9   : > { %v499_v61 = vand.u32 2147483647, %v497_v59 }
  0xea   : > { %v500_v62 = vmul.f32 0.0625, %v498_v60 }
  0xeb   : > { %v501_v63 = vmul.f32 0.0625, %v499_v61 }
  0xec   : > { %v502_v0 = vfloor.f32 %v500_v62 }
  0xed   : > { %v503_v1 = vfloor.f32 %v501_v63 }
  0xee   : > { %v504_v2 = vmul.f32 16.0, %v502_v0  ;;  %v508_v3 = vmul.f32 0.5, %v502_v0 }
  0xef   : > { %v505_v4 = vmul.f32 16.0, %v503_v1  ;;  %v509_v51 = vmul.f32 0.5, %v503_v1 }
  0xf0   : > { %v506_v5 = vsub.f32 %v498_v60, %v504_v2  ;;  %v510_v6 = vfloor.f32 %v508_v3 }
  0xf1   : > { %v507_v7 = vsub.f32 %v499_v61, %v505_v4  ;;  %v511_v8 = vfloor.f32 %v509_v51 }
  0xf2   : > { %v512_v9 = vmul.f32 2.0, %v510_v6  ;;  %v518_v55 = vsub.f32 16.0, %v506_v5  ;;  %v1815_v17 = vadd.f32 -0.5, %v506_v5 }
  0xf3   : > { %v513_v10 = vmul.f32 2.0, %v511_v8  ;;  %v519_v11 = vsub.f32 16.0, %v507_v7  ;;  %v1816_v18 = vadd.f32 -0.5, %v507_v7 }
  0xf4   : > { %v514_v13 = vsub.f32 %v502_v0, %v512_v9  ;;  %v1813_v14 = vadd.f32 -0.5, %v518_v55 }
  0xf5   : > { %v515_v15 = vsub.f32 %v503_v1, %v513_v10  ;;  %v1814_v16 = vadd.f32 -0.5, %v519_v11 }
  0xf6   : > { %vm516_vm1 = vcmp.gt.f32.partialorder %v514_v13, 0.5 }
  0xf7   : > { %vm517_vm2 = vcmp.gt.f32.partialorder %v515_v15, 0.5  ;;  %v524_v19 = vsel %vm516_vm1, %v1813_v14, %v1815_v17 }
  0xf8   : > { %v525_v20 = vsel %vm517_vm2, %v1814_v16, %v1816_v18  ;;  %v526_v21 = vmax.f32 %v524_v19, 0.0 }
  0xf9   : > { %v527_v22 = vmax.f32 %v525_v20, 0.0 }
  0xfa   : > { %v528_v23 = vmin.f32 %v526_v21, 15.0 }
  0xfb   : > { %v529_v24 = vmin.f32 %v527_v22, 15.0 }
  0xfc   : > { %v2276_v25 = vfloor.f32 %v528_v23  ;;  %1748 = sbr.rel (%p1745_p8) target bundleno = 743 (0x2e7), region = 79 }
  0xfd   : > { %v2278_v26 = vfloor.f32 %v529_v24 }
  0xfe   : > { %v2281_v27 = vsub.f32 %v528_v23, %v2276_v25  ;;  %v2284_v28 = vadd.f32 1.0, %v2276_v25 }
  0xff   : > { %v2287_v29 = vsub.f32 %v529_v24, %v2278_v26  ;;  %v2290_v30 = vadd.f32 1.0, %v2278_v26 }
 0x100   : > { %vm538_vm3 = vcmp.le.f32.partialorder %v2284_v28, 15.0  ;;  %v542_v32 = vmin.f32 %v2284_v28, 15.0 }
 0x101   : > { %v535_v33 = vsub.f32 1.0, %v2287_v29  ;;  %vm539_vm4 = vcmp.le.f32.partialorder %v2290_v30, 15.0  ;;  %v2298_v34 = vsel %vm538_vm3, %v2281_v27, 0.0  ;;  %v543_v39 = vmin.f32 %v2290_v30, 15.0 }
 0x102   : > { %v2302_v40 = vsel %vm539_vm4, %v2287_v29, 0.0 }
 0x103 LB: >> { %v3282_v12 = vlaneseq  ;;  %s1819_s11 = sshll.u32 %s2088_s28, 8  ;;  %v3283_v31 = vsub.f32 1.0, %v2281_v27  ;;  %s1827_s12 = sshll.u32 %s2088_s28, 3  ;;  %s2088_s28 = sphi %s2235_s28, %s551_s28   ;;  %v2084_v44 = vphi %v2314_v44, %v3285_v44   ;;  %v2080_v43 = vphi %v2312_v43, %v3284_v43  }
 0x104   : >> { %v2336_v50 = vstv %s1819_s11  ;;  %s558_s14 = scalar_lea.vmem %s2211_s27, %s1827_s12  ;;  %s551_s28 = sadd.s32 1, %s2088_s28  }
 0x105   : >> { %v2329_v45 = vshrl.u32 %v3282_v12, 7  ;;  %p550_p9 = scmp.ge.s32.totalorder %s551_s28, %s547_s29 }
 0x107   : >> { %v563_v46 = vadd.s32 8, %v2329_v45  ;;  %v821_v47 = vsub.s32 1, %v2329_v45  ;;  %v1173_v48 = vsub.s32 0, %v2329_v45  ;;  %v564_v49 = vadd.s32 16, %v2329_v45 }
 0x108   : >> { %v565_v35 = vadd.s32 24, %v2329_v45  ;;  %v566_v52 = vadd.s32 32, %v2329_v45  ;;  %v567_v53 = vadd.s32 40, %v2329_v45  ;;  %v595_v36 = vadd.s32 %v2336_v50, %v2329_v45 }
 0x109   : >> { %v596_v54 = vadd.s32 %v2336_v50, %v563_v46  ;;  %v2345_v37 = vrot.slane %v2278_v26, %v821_v47  ;;  %v2349_v56 = vrot.slane %v535_v33, %v821_v47  ;;  %v2353_v57 = vrot.slane %v543_v39, %v821_v47 }
 0x10a   : >> { %v2356_v38 = vrot.slane %v2302_v40, %v821_v47  ;;  %v2359_v58 = vrot.slane %v2278_v26, %v1173_v48  ;;  %v2363_v59 = vrot.slane %v535_v33, %v1173_v48  ;;  %v627_v60 = vcvt.s32.f32 %v595_v36 }
 0x10b   : >> { %v628_v61 = vcvt.s32.f32 %v596_v54  ;;  %v2367_v62 = vrot.slane %v543_v39, %v1173_v48  ;;  %v2370_v63 = vrot.slane %v2302_v40, %v1173_v48  ;;  %v2373_v0 = vrot.slane %v2276_v25, %v821_v47 }
 0x10c   : >> { %v2377_v1 = vrot.slane %v3283_v31, %v821_v47  ;;  %v2381_v2 = vrot.slane %v542_v32, %v821_v47  ;;  %v2384_v3 = vrot.slane %v2298_v34, %v821_v47  ;;  %v659_v4 = vadd.f32 0.5, %v627_v60 }
 0x10d   : >> { %v660_v51 = vadd.f32 0.5, %v628_v61  ;;  %v2387_v5 = vrot.slane %v2276_v25, %v1173_v48  ;;  %v2391_v6 = vrot.slane %v3283_v31, %v1173_v48  ;;  %v2395_v7 = vrot.slane %v542_v32, %v1173_v48 }
 0x10e   : >> { %v2398_v8 = vrot.slane %v2298_v34, %v1173_v48  ;;  %v2401_v9 = vadd.s32 %v2336_v50, %v564_v49  ;;  %v2404_v55 = vadd.s32 %v2336_v50, %v565_v35  ;;  %v691_v10 = vmul.f32 0.0625, %v659_v4 }
 0x10f   : >> { %v692_v11 = vmul.f32 0.0625, %v660_v51  ;;  %v2407_v13 = vadd.s32 %v2336_v50, %v566_v52  ;;  %v2410_v14 = vadd.s32 %v2336_v50, %v567_v53  ;;  %v568_v17 = vadd.s32 48, %v2329_v45 }
 0x110   : >> { %v629_v15 = vcvt.s32.f32 %v2401_v9  ;;  %v630_v16 = vcvt.s32.f32 %v2404_v55  ;;  %v569_v18 = vadd.s32 56, %v2329_v45  ;;  %v723_v19 = vfloor.f32 %v691_v10 }
 0x111   : >> { %v724_v20 = vfloor.f32 %v692_v11  ;;  %v631_v21 = vcvt.s32.f32 %v2407_v13  ;;  %v632_v22 = vcvt.s32.f32 %v2410_v14  ;;  %v2423_v41 = vadd.s32 %v2336_v50, %v568_v17 }
 0x112   : >> { %v661_v23 = vadd.f32 0.5, %v629_v15  ;;  %v662_v24 = vadd.f32 0.5, %v630_v16  ;;  %v2426_v42 = vadd.s32 %v2336_v50, %v569_v18  ;;  %v755_v46 = vmul.f32 16.0, %v723_v19 }
 0x113   : >> { %v756_v47 = vmul.f32 16.0, %v724_v20  ;;  %vm828_vm5 = vcmp.eq.f32.partialorder %v723_v19, %v2345_v37  ;;  %vm830_vm6 = vcmp.eq.f32.partialorder %v724_v20, %v2345_v37  ;;  %vm972_vm7 = vcmp.eq.f32.partialorder %v723_v19, %v2353_v57 }
 0x114   : >> { %v900_v48 = vsel %vm828_vm5, %v2349_v56, 0.0  ;;  %v902_v49 = vsel %vm830_vm6, %v2349_v56, 0.0  ;;  %vm974_vm8 = vcmp.eq.f32.partialorder %v724_v20, %v2353_v57  ;;  %v787_v35 = vsub.f32 %v627_v60, %v755_v46 }
 0x115   : >> { %v788_v52 = vsub.f32 %v628_v61, %v756_v47  ;;  %v1044_v53 = vsel %vm972_vm7, %v2356_v38, 0.0  ;;  %v1046_v36 = vsel %vm974_vm8, %v2356_v38, 0.0  ;;  %vm827_vm9 = vcmp.eq.f32.partialorder %v723_v19, %v2373_v0 }
 0x116   : >> { %v1108_v54 = vadd.f32 %v1044_v53, %v900_v48  ;;  %v1110_v4 = vadd.f32 %v1046_v36, %v902_v49  ;;  %vm829_vm10 = vcmp.eq.f32.partialorder %v724_v20, %v2373_v0  ;;  %vm1180_vm11 = vcmp.eq.f32.partialorder %v787_v35, %v2359_v58 }
 0x117   : >> { %vm1182_vm12 = vcmp.eq.f32.partialorder %v788_v52, %v2359_v58  ;;  %vm1324_vm13 = vcmp.eq.f32.partialorder %v787_v35, %v2367_v62  ;;  %vm1326_vm14 = vcmp.eq.f32.partialorder %v788_v52, %v2367_v62  ;;  %v1252_v60 = vsel %vm1180_vm11, %v2363_v59, 0.0 }
 0x118   : >> { %v1254_v61 = vsel %vm1182_vm12, %v2363_v59, 0.0  ;;  %v1396_v51 = vsel %vm1324_vm13, %v2370_v63, 0.0  ;;  %v1398_v10 = vsel %vm1326_vm14, %v2370_v63, 0.0  ;;  %v899_v18 = vsel %vm827_vm9, %v2377_v1, 0.0 }
 0x119   : >> { %v1460_v11 = vadd.f32 %v1396_v51, %v1252_v60  ;;  %v1462_v17 = vadd.f32 %v1398_v10, %v1254_v61  ;;  %v901_v46 = vsel %vm829_vm10, %v2377_v1, 0.0  ;;  %vm971_vm15 = vcmp.eq.f32.partialorder %v723_v19, %v2381_v2 }
 0x11a   : >> { %vm973_vm0 = vcmp.eq.f32.partialorder %v724_v20, %v2381_v2  ;;  %vm1179_vm1 = vcmp.eq.f32.partialorder %v787_v35, %v2387_v5  ;;  %vm1181_vm2 = vcmp.eq.f32.partialorder %v788_v52, %v2387_v5  ;;  %v1043_v49 = vsel %vm971_vm15, %v2384_v3, 0.0 }
 0x11b   : >> { %v1524_v47 = vmul.f32 %v1460_v11, %v1108_v54  ;;  %v1526_v48 = vmul.f32 %v1462_v17, %v1110_v4  ;;  %v1045_v53 = vsel %vm973_vm0, %v2384_v3, 0.0  ;;  %v1107_v36 = vadd.f32 %v1043_v49, %v899_v18 }
 0x11c   : >> { %v1109_v60 = vadd.f32 %v1045_v53, %v901_v46  ;;  %v1251_v61 = vsel %vm1179_vm1, %v2391_v6, 0.0  ;;  %v1253_v51 = vsel %vm1181_vm2, %v2391_v6, 0.0  ;;  %vm1323_vm3 = vcmp.eq.f32.partialorder %v787_v35, %v2395_v7 }
 0x11d   : >> { %v1588_v10 = vpack.c.bf16 %v1526_v48, %v1524_v47  ;;  %vm1325_vm4 = vcmp.eq.f32.partialorder %v788_v52, %v2395_v7  ;;  %v693_v19 = vmul.f32 0.0625, %v661_v23  ;;  %v1395_v20 = vsel %vm1323_vm3, %v2398_v8, 0.0 }
 0x11e   : >> { %v1397_v54 = vsel %vm1325_vm4, %v2398_v8, 0.0  ;;  %v694_v4 = vmul.f32 0.0625, %v662_v24  ;;  %v663_v11 = vadd.f32 0.5, %v631_v21  ;;  %v1459_v17 = vadd.f32 %v1395_v20, %v1251_v61 }
 0x11f   : >> { %1624 = vmatprep.subr.bf16.mxu0 %v1588_v10  ;;  %v1461_v18 = vadd.f32 %v1397_v54, %v1253_v51  ;;  %v725_v46 = vfloor.f32 %v693_v19  ;;  %v664_v47 = vadd.f32 0.5, %v632_v22  ;;  %v633_v52 = vcvt.s32.f32 %v2423_v41 }
 0x120   : >> { %v726_v48 = vfloor.f32 %v694_v4  ;;  %v695_v35 = vmul.f32 0.0625, %v663_v11  ;;  %v634_v23 = vcvt.s32.f32 %v2426_v42  ;;  %v1523_v49 = vmul.f32 %v1459_v17, %v1107_v36 }
 0x121   : >> { %v1525_v53 = vmul.f32 %v1461_v18, %v1109_v60  ;;  %v757_v12 = vmul.f32 16.0, %v725_v46  ;;  %vm832_vm5 = vcmp.eq.f32.partialorder %v725_v46, %v2345_v37  ;;  %vm976_vm7 = vcmp.eq.f32.partialorder %v725_v46, %v2353_v57 }
 0x122   : >> { %v758_v24 = vmul.f32 16.0, %v726_v48  ;;  %vm834_vm6 = vcmp.eq.f32.partialorder %v726_v48, %v2345_v37  ;;  %v904_v61 = vsel %vm832_vm5, %v2349_v56, 0.0  ;;  %vm978_vm8 = vcmp.eq.f32.partialorder %v726_v48, %v2353_v57 }
 0x123   : >> { %v1587_v51 = vpack.c.bf16 %v1525_v53, %v1523_v49  ;;  %v789_v10 = vsub.f32 %v629_v15, %v757_v12  ;;  %v906_v19 = vsel %vm834_vm6, %v2349_v56, 0.0  ;;  %v1048_v60 = vsel %vm976_vm7, %v2356_v38, 0.0 }
 0x124   : >> { %v790_v36 = vsub.f32 %v630_v16, %v758_v24  ;;  %v1050_v20 = vsel %vm978_vm8, %v2356_v38, 0.0  ;;  %vm831_vm9 = vcmp.eq.f32.partialorder %v725_v46, %v2373_v0  ;;  %v1112_v54 = vadd.f32 %v1048_v60, %v904_v61 }
 0x125   : >> { %1625 = vmatpush1.bf16.msra.mxu0 %v1587_v51  ;;  %v1114_v4 = vadd.f32 %v1050_v20, %v906_v19  ;;  %vm1184_vm10 = vcmp.eq.f32.partialorder %v789_v10, %v2359_v58  ;;  %vm1328_vm11 = vcmp.eq.f32.partialorder %v789_v10, %v2367_v62  ;;  %vm833_vm14 = vcmp.eq.f32.partialorder %v726_v48, %v2373_v0 }
 0x126   : >> { %vm1186_vm12 = vcmp.eq.f32.partialorder %v790_v36, %v2359_v58  ;;  %v1256_v12 = vsel %vm1184_vm10, %v2363_v59, 0.0  ;;  %vm1330_vm13 = vcmp.eq.f32.partialorder %v790_v36, %v2367_v62  ;;  %v1400_v9 = vsel %vm1328_vm11, %v2370_v63, 0.0 }
 0x127   : >> { %v1258_v55 = vsel %vm1186_vm12, %v2363_v59, 0.0  ;;  %v1402_v15 = vsel %vm1330_vm13, %v2370_v63, 0.0  ;;  %v1464_v16 = vadd.f32 %v1400_v9, %v1256_v12  ;;  %v903_v17 = vsel %vm831_vm9, %v2377_v1, 0.0 }
 0x128   : >> { %v1466_v11 = vadd.f32 %v1402_v15, %v1258_v55  ;;  %v905_v18 = vsel %vm833_vm14, %v2377_v1, 0.0  ;;  %vm975_vm15 = vcmp.eq.f32.partialorder %v725_v46, %v2381_v2  ;;  %vm977_vm0 = vcmp.eq.f32.partialorder %v726_v48, %v2381_v2 }
 0x129   : >> { %v1528_v49 = vmul.f32 %v1464_v16, %v1112_v54  ;;  %v1047_v53 = vsel %vm975_vm15, %v2384_v3, 0.0  ;;  %vm1183_vm1 = vcmp.eq.f32.partialorder %v789_v10, %v2387_v5  ;;  %v1049_v61 = vsel %vm977_vm0, %v2384_v3, 0.0 }
 0x12a   : >> { %v1530_v24 = vmul.f32 %v1466_v11, %v1114_v4  ;;  %v1111_v51 = vadd.f32 %v1047_v53, %v903_v17  ;;  %vm1185_vm2 = vcmp.eq.f32.partialorder %v790_v36, %v2387_v5  ;;  %v1113_v19 = vadd.f32 %v1049_v61, %v905_v18 }
 0x12b   : >> { %v1255_v60 = vsel %vm1183_vm1, %v2391_v6, 0.0  ;;  %v1257_v20 = vsel %vm1185_vm2, %v2391_v6, 0.0  ;;  %vm1327_vm3 = vcmp.eq.f32.partialorder %v789_v10, %v2395_v7  ;;  %vm1329_vm4 = vcmp.eq.f32.partialorder %v790_v36, %v2395_v7 }
 0x12c   : >> { %v1590_v46 = vpack.c.bf16 %v1530_v24, %v1528_v49  ;;  %v1399_v48 = vsel %vm1327_vm3, %v2398_v8, 0.0  ;;  %v696_v54 = vmul.f32 0.0625, %v664_v47  ;;  %v1401_v4 = vsel %vm1329_vm4, %v2398_v8, 0.0 }
 0x12d   : >> { %v1463_v12 = vadd.f32 %v1399_v48, %v1255_v60  ;;  %v727_v9 = vfloor.f32 %v695_v35  ;;  %v665_v55 = vadd.f32 0.5, %v633_v52  ;;  %v1465_v15 = vadd.f32 %v1401_v4, %v1257_v20 }
 0x12e   : >> { %1626 = vmatprep.subr.bf16.mxu0 %v1590_v46  ;;  %v728_v16 = vfloor.f32 %v696_v54  ;;  %v666_v11 = vadd.f32 0.5, %v634_v23  ;;  %v570_v10 = vadd.s32 64, %v2329_v45 }
 0x12f   : >> { %v1527_v17 = vmul.f32 %v1463_v12, %v1111_v51  ;;  %v759_v36 = vmul.f32 16.0, %v727_v9  ;;  %vm836_vm5 = vcmp.eq.f32.partialorder %v727_v9, %v2345_v37  ;;  %vm980_vm6 = vcmp.eq.f32.partialorder %v727_v9, %v2353_v57 }
 0x130   : >> { %v1529_v47 = vmul.f32 %v1465_v15, %v1113_v19  ;;  %v760_v18 = vmul.f32 16.0, %v728_v16  ;;  %vm838_vm7 = vcmp.eq.f32.partialorder %v728_v16, %v2345_v37  ;;  %v908_v35 = vsel %vm836_vm5, %v2349_v56, 0.0 }
 0x131   : >> { %v791_v49 = vsub.f32 %v631_v21, %v759_v36  ;;  %v910_v53 = vsel %vm838_vm7, %v2349_v56, 0.0  ;;  %vm982_vm8 = vcmp.eq.f32.partialorder %v728_v16, %v2353_v57  ;;  %v1052_v24 = vsel %vm980_vm6, %v2356_v38, 0.0 }
 0x132   : >> { %v1589_v61 = vpack.c.bf16 %v1529_v47, %v1527_v17  ;;  %v792_v51 = vsub.f32 %v632_v22, %v760_v18  ;;  %v1054_v19 = vsel %vm982_vm8, %v2356_v38, 0.0  ;;  %v1116_v60 = vadd.f32 %v1052_v24, %v908_v35 }
 0x133   : >> { %v1118_v20 = vadd.f32 %v1054_v19, %v910_v53  ;;  %vm1188_vm9 = vcmp.eq.f32.partialorder %v791_v49, %v2359_v58  ;;  %vm1332_vm10 = vcmp.eq.f32.partialorder %v791_v49, %v2367_v62  ;;  %vm835_vm11 = vcmp.eq.f32.partialorder %v727_v9, %v2373_v0 }
 0x134   : >> { %1627 = vmatpush1.bf16.msra.mxu0 %v1589_v61  ;;  %vm1190_vm12 = vcmp.eq.f32.partialorder %v792_v51, %v2359_v58  ;;  %v1260_v13 = vsel %vm1188_vm9, %v2363_v59, 0.0  ;;  %vm1334_vm13 = vcmp.eq.f32.partialorder %v792_v51, %v2367_v62  ;;  %v1404_v14 = vsel %vm1332_vm10, %v2370_v63, 0.0 }
 0x135   : >> { %v1262_v21 = vsel %vm1190_vm12, %v2363_v59, 0.0  ;;  %v1406_v22 = vsel %vm1334_vm13, %v2370_v63, 0.0  ;;  %v1468_v46 = vadd.f32 %v1404_v14, %v1260_v13  ;;  %vm837_vm14 = vcmp.eq.f32.partialorder %v728_v16, %v2373_v0 }
 0x136   : >> { %v1470_v48 = vadd.f32 %v1406_v22, %v1262_v21  ;;  %v907_v54 = vsel %vm835_vm11, %v2377_v1, 0.0  ;;  %v909_v4 = vsel %vm837_vm14, %v2377_v1, 0.0  ;;  %vm979_vm15 = vcmp.eq.f32.partialorder %v727_v9, %v2381_v2 }
 0x137   : >> { %v1532_v12 = vmul.f32 %v1468_v46, %v1116_v60  ;;  %vm981_vm0 = vcmp.eq.f32.partialorder %v728_v16, %v2381_v2  ;;  %v1051_v15 = vsel %vm979_vm15, %v2384_v3, 0.0  ;;  %vm1187_vm1 = vcmp.eq.f32.partialorder %v791_v49, %v2387_v5 }
 0x138   : >> { %v1534_v17 = vmul.f32 %v1470_v48, %v1118_v20  ;;  %v1053_v36 = vsel %vm981_vm0, %v2384_v3, 0.0  ;;  %v1115_v47 = vadd.f32 %v1051_v15, %v907_v54  ;;  %vm1189_vm2 = vcmp.eq.f32.partialorder %v792_v51, %v2387_v5 }
 0x139   : >> { %v1117_v18 = vadd.f32 %v1053_v36, %v909_v4  ;;  %v1259_v35 = vsel %vm1187_vm1, %v2391_v6, 0.0  ;;  %v1261_v53 = vsel %vm1189_vm2, %v2391_v6, 0.0  ;;  %vm1331_vm3 = vcmp.eq.f32.partialorder %v791_v49, %v2395_v7 }
 0x13a   : >> { %v1592_v9 = vpack.c.bf16 %v1534_v17, %v1532_v12  ;;  %vm1333_vm4 = vcmp.eq.f32.partialorder %v792_v51, %v2395_v7  ;;  %v1403_v16 = vsel %vm1331_vm3, %v2398_v8, 0.0  ;;  %v697_v24 = vmul.f32 0.0625, %v665_v55 }
 0x13b   : >> { %v1405_v61 = vsel %vm1333_vm4, %v2398_v8, 0.0  ;;  %v1467_v19 = vadd.f32 %v1403_v16, %v1259_v35  ;;  %v698_v60 = vmul.f32 0.0625, %v666_v11  ;;  %v571_v20 = vadd.s32 72, %v2329_v45 }
 0x13c   : >> { %1628 = vmatprep.subr.bf16.mxu0 %v1592_v9  ;;  %v1469_v13 = vadd.f32 %v1405_v61, %v1261_v53  ;;  %v729_v14 = vfloor.f32 %v697_v24  ;;  %v2545_v21 = vadd.s32 %v2336_v50, %v570_v10  ;;  %v572_v49 = vadd.s32 80, %v2329_v45 }
 0x13d   : >> { %v1531_v22 = vmul.f32 %v1467_v19, %v1115_v47  ;;  %v730_v46 = vfloor.f32 %v698_v60  ;;  %v2549_v51 = vadd.s32 %v2336_v50, %v571_v20  ;;  %v573_v55 = vadd.s32 88, %v2329_v45 }
 0x13e   : >> { %v1533_v48 = vmul.f32 %v1469_v13, %v1117_v18  ;;  %v761_v54 = vmul.f32 16.0, %v729_v14  ;;  %vm840_vm5 = vcmp.eq.f32.partialorder %v729_v14, %v2345_v37  ;;  %vm984_vm6 = vcmp.eq.f32.partialorder %v729_v14, %v2353_v57 }
 0x13f   : >> { %v762_v11 = vmul.f32 16.0, %v730_v46  ;;  %vm842_vm7 = vcmp.eq.f32.partialorder %v730_v46, %v2345_v37  ;;  %v912_v10 = vsel %vm840_vm5, %v2349_v56, 0.0  ;;  %vm986_vm8 = vcmp.eq.f32.partialorder %v730_v46, %v2353_v57 }
 0x140   : >> { %v1591_v4 = vpack.c.bf16 %v1533_v48, %v1531_v22  ;;  %v793_v12 = vsub.f32 %v633_v52, %v761_v54  ;;  %v914_v15 = vsel %vm842_vm7, %v2349_v56, 0.0  ;;  %v1056_v17 = vsel %vm984_vm6, %v2356_v38, 0.0 }
 0x141   : >> { %v794_v36 = vsub.f32 %v634_v23, %v762_v11  ;;  %v1058_v47 = vsel %vm986_vm8, %v2356_v38, 0.0  ;;  %v1120_v18 = vadd.f32 %v1056_v17, %v912_v10  ;;  %vm839_vm9 = vcmp.eq.f32.partialorder %v729_v14, %v2373_v0 }
 0x142   : >> { %1629 = vmatpush1.bf16.msra.mxu0 %v1591_v4  ;;  %v1122_v35 = vadd.f32 %v1058_v47, %v914_v15  ;;  %vm1192_vm10 = vcmp.eq.f32.partialorder %v793_v12, %v2359_v58  ;;  %vm1336_vm11 = vcmp.eq.f32.partialorder %v793_v12, %v2367_v62  ;;  %vm841_vm12 = vcmp.eq.f32.partialorder %v730_v46, %v2373_v0 }
 0x143   : >> { %vm1194_vm13 = vcmp.eq.f32.partialorder %v794_v36, %v2359_v58  ;;  %v1264_v41 = vsel %vm1192_vm10, %v2363_v59, 0.0  ;;  %vm1338_vm14 = vcmp.eq.f32.partialorder %v794_v36, %v2367_v62  ;;  %v1408_v42 = vsel %vm1336_vm11, %v2370_v63, 0.0 }
 0x144   : >> { %v1266_v52 = vsel %vm1194_vm13, %v2363_v59, 0.0  ;;  %v1410_v23 = vsel %vm1338_vm14, %v2370_v63, 0.0  ;;  %v1472_v53 = vadd.f32 %v1408_v42, %v1264_v41  ;;  %v911_v9 = vsel %vm839_vm9, %v2377_v1, 0.0 }
 0x145   : >> { %v1474_v16 = vadd.f32 %v1410_v23, %v1266_v52  ;;  %v913_v24 = vsel %vm841_vm12, %v2377_v1, 0.0  ;;  %vm983_vm15 = vcmp.eq.f32.partialorder %v729_v14, %v2381_v2  ;;  %vm985_vm0 = vcmp.eq.f32.partialorder %v730_v46, %v2381_v2 }
 0x146   : >> { %v1536_v61 = vmul.f32 %v1472_v53, %v1120_v18  ;;  %v1055_v19 = vsel %vm983_vm15, %v2384_v3, 0.0  ;;  %v1057_v60 = vsel %vm985_vm0, %v2384_v3, 0.0  ;;  %vm1191_vm1 = vcmp.eq.f32.partialorder %v793_v12, %v2387_v5 }
 0x147   : >> { %v1538_v20 = vmul.f32 %v1474_v16, %v1122_v35  ;;  %v1119_v13 = vadd.f32 %v1055_v19, %v911_v9  ;;  %v1121_v22 = vadd.f32 %v1057_v60, %v913_v24  ;;  %vm1193_vm2 = vcmp.eq.f32.partialorder %v794_v36, %v2387_v5 }
 0x148   : >> { %v1263_v48 = vsel %vm1191_vm1, %v2391_v6, 0.0  ;;  %v1265_v54 = vsel %vm1193_vm2, %v2391_v6, 0.0  ;;  %vm1335_vm3 = vcmp.eq.f32.partialorder %v793_v12, %v2395_v7  ;;  %vm1337_vm4 = vcmp.eq.f32.partialorder %v794_v36, %v2395_v7 }
 0x149   : >> { %v1594_v14 = vpack.c.bf16 %v1538_v20, %v1536_v61  ;;  %v1407_v46 = vsel %vm1335_vm3, %v2398_v8, 0.0  ;;  %v1409_v11 = vsel %vm1337_vm4, %v2398_v8, 0.0  ;;  %v635_v10 = vcvt.s32.f32 %v2545_v21 }
 0x14a   : >> { %v1471_v4 = vadd.f32 %v1407_v46, %v1263_v48  ;;  %v1473_v15 = vadd.f32 %v1409_v11, %v1265_v54  ;;  %v636_v17 = vcvt.s32.f32 %v2549_v51  ;;  %v2591_v47 = vadd.s32 %v2336_v50, %v572_v49 }
 0x14b   : >> { %1630 = vmatprep.subr.bf16.mxu0 %v1594_v14  ;;  %v667_v18 = vadd.f32 0.5, %v635_v10  ;;  %v2594_v12 = vadd.s32 %v2336_v50, %v573_v55  ;;  %v574_v36 = vadd.s32 96, %v2329_v45  ;;  %v575_v35 = vadd.s32 104, %v2329_v45 }
 0x14c   : >> { %v1535_v41 = vmul.f32 %v1471_v4, %v1119_v13  ;;  %v1537_v42 = vmul.f32 %v1473_v15, %v1121_v22  ;;  %v668_v52 = vadd.f32 0.5, %v636_v17  ;;  %v637_v21 = vcvt.s32.f32 %v2591_v47 }
 0x14d   : >> { %v699_v23 = vmul.f32 0.0625, %v667_v18  ;;  %v638_v51 = vcvt.s32.f32 %v2594_v12  ;;  %v2601_v49 = vadd.s32 %v2336_v50, %v574_v36  ;;  %v2604_v53 = vadd.s32 %v2336_v50, %v575_v35 }
 0x14e   : >> { %v1593_v55 = vpack.c.bf16 %v1537_v42, %v1535_v41  ;;  %v700_v9 = vmul.f32 0.0625, %v668_v52  ;;  %v669_v16 = vadd.f32 0.5, %v637_v21  ;;  %v576_v24 = vadd.s32 112, %v2329_v45 }
 0x14f   : >> { %v731_v61 = vfloor.f32 %v699_v23  ;;  %v670_v19 = vadd.f32 0.5, %v638_v51  ;;  %v639_v60 = vcvt.s32.f32 %v2601_v49  ;;  %v640_v20 = vcvt.s32.f32 %v2604_v53 }
 0x150   : >> { %1631 = vmatpush1.bf16.msra.mxu0 %v1593_v55  ;;  %v732_v13 = vfloor.f32 %v700_v9  ;;  %v701_v22 = vmul.f32 0.0625, %v669_v16  ;;  %v2614_v48 = vadd.s32 120, %v2329_v45  ;;  %v2617_v54 = vadd.s32 %v2336_v50, %v576_v24 }
 0x151   : >> { %v763_v14 = vmul.f32 16.0, %v731_v61  ;;  %vm844_vm5 = vcmp.eq.f32.partialorder %v731_v61, %v2345_v37  ;;  %vm988_vm6 = vcmp.eq.f32.partialorder %v731_v61, %v2353_v57  ;;  %vm843_vm7 = vcmp.eq.f32.partialorder %v731_v61, %v2373_v0 }
 0x152   : >> { %v764_v46 = vmul.f32 16.0, %v732_v13  ;;  %vm846_vm8 = vcmp.eq.f32.partialorder %v732_v13, %v2345_v37  ;;  %v916_v11 = vsel %vm844_vm5, %v2349_v56, 0.0  ;;  %vm990_vm9 = vcmp.eq.f32.partialorder %v732_v13, %v2353_v57 }
 0x153   : >> { %v795_v4 = vsub.f32 %v635_v10, %v763_v14  ;;  %v918_v15 = vsel %vm846_vm8, %v2349_v56, 0.0  ;;  %v1060_v18 = vsel %vm988_vm6, %v2356_v38, 0.0  ;;  %v1062_v36 = vsel %vm990_vm9, %v2356_v38, 0.0 }
 0x154   : >> { %v796_v35 = vsub.f32 %v636_v17, %v764_v46  ;;  %v1124_v41 = vadd.f32 %v1060_v18, %v916_v11  ;;  %v1126_v42 = vadd.f32 %v1062_v36, %v918_v15  ;;  %vm845_vm10 = vcmp.eq.f32.partialorder %v732_v13, %v2373_v0 }
 0x155   : >> { %vm1196_vm11 = vcmp.eq.f32.partialorder %v795_v4, %v2359_v58  ;;  %vm1340_vm12 = vcmp.eq.f32.partialorder %v795_v4, %v2367_v62  ;;  %v915_v52 = vsel %vm843_vm7, %v2377_v1, 0.0  ;;  %v917_v23 = vsel %vm845_vm10, %v2377_v1, 0.0 }
 0x156   : >> { %vm1198_vm13 = vcmp.eq.f32.partialorder %v796_v35, %v2359_v58  ;;  %v1268_v10 = vsel %vm1196_vm11, %v2363_v59, 0.0  ;;  %vm1342_vm14 = vcmp.eq.f32.partialorder %v796_v35, %v2367_v62  ;;  %v1412_v17 = vsel %vm1340_vm12, %v2370_v63, 0.0 }
 0x157   : >> { %v1270_v55 = vsel %vm1198_vm13, %v2363_v59, 0.0  ;;  %v1414_v9 = vsel %vm1342_vm14, %v2370_v63, 0.0  ;;  %v1476_v16 = vadd.f32 %v1412_v17, %v1268_v10  ;;  %vm987_vm15 = vcmp.eq.f32.partialorder %v731_v61, %v2381_v2 }
 0x158   : >> { %v1478_v24 = vadd.f32 %v1414_v9, %v1270_v55  ;;  %vm989_vm0 = vcmp.eq.f32.partialorder %v732_v13, %v2381_v2  ;;  %v1059_v14 = vsel %vm987_vm15, %v2384_v3, 0.0  ;;  %vm1195_vm1 = vcmp.eq.f32.partialorder %v795_v4, %v2387_v5 }
 0x159   : >> { %v1540_v46 = vmul.f32 %v1476_v16, %v1124_v41  ;;  %v1061_v11 = vsel %vm989_vm0, %v2384_v3, 0.0  ;;  %v1123_v15 = vadd.f32 %v1059_v14, %v915_v52  ;;  %vm1197_vm2 = vcmp.eq.f32.partialorder %v796_v35, %v2387_v5 }
 0x15a   : >> { %v1542_v18 = vmul.f32 %v1478_v24, %v1126_v42  ;;  %v1125_v36 = vadd.f32 %v1061_v11, %v917_v23  ;;  %v1267_v31 = vsel %vm1195_vm1, %v2391_v6, 0.0  ;;  %v1269_v10 = vsel %vm1197_vm2, %v2391_v6, 0.0 }
 0x15b   : >> { %vm1339_vm3 = vcmp.eq.f32.partialorder %v795_v4, %v2395_v7  ;;  %vm1341_vm4 = vcmp.eq.f32.partialorder %v796_v35, %v2395_v7  ;;  %v702_v61 = vmul.f32 0.0625, %v670_v19  ;;  %v733_v13 = vfloor.f32 %v701_v22 }
 0x15c   : >> { %v1596_v17 = vpack.c.bf16 %v1542_v18, %v1540_v46  ;;  %v1411_v41 = vsel %vm1339_vm3, %v2398_v8, 0.0  ;;  %v1413_v55 = vsel %vm1341_vm4, %v2398_v8, 0.0  ;;  %v671_v52 = vadd.f32 0.5, %v639_v60 }
 0x15d   : >> { %v1475_v42 = vadd.f32 %v1411_v41, %v1267_v31  ;;  %v1477_v23 = vadd.f32 %v1413_v55, %v1269_v10  ;;  %v734_v9 = vfloor.f32 %v702_v61  ;;  %v765_v16 = vmul.f32 16.0, %v733_v13 }
 0x15e   : >> { %1632 = vmatprep.subr.bf16.mxu0 %v1596_v17  ;;  %vm848_vm5 = vcmp.eq.f32.partialorder %v733_v13, %v2345_v37  ;;  %vm992_vm6 = vcmp.eq.f32.partialorder %v733_v13, %v2353_v57  ;;  %vm847_vm7 = vcmp.eq.f32.partialorder %v733_v13, %v2373_v0  ;;  %vm991_vm8 = vcmp.eq.f32.partialorder %v733_v13, %v2381_v2 }
 0x15f   : >> { %v1539_v19 = vmul.f32 %v1475_v42, %v1123_v15  ;;  %v1541_v22 = vmul.f32 %v1477_v23, %v1125_v36  ;;  %v766_v4 = vmul.f32 16.0, %v734_v9  ;;  %v797_v35 = vsub.f32 %v637_v21, %v765_v16 }
 0x160   : >> { %vm850_vm9 = vcmp.eq.f32.partialorder %v734_v9, %v2345_v37  ;;  %v920_v31 = vsel %vm848_vm5, %v2349_v56, 0.0  ;;  %vm994_vm10 = vcmp.eq.f32.partialorder %v734_v9, %v2353_v57  ;;  %v1064_v24 = vsel %vm992_vm6, %v2356_v38, 0.0 }
 0x161   : >> { %v1595_v14 = vpack.c.bf16 %v1541_v22, %v1539_v19  ;;  %v798_v46 = vsub.f32 %v638_v51, %v766_v4  ;;  %v922_v11 = vsel %vm850_vm9, %v2349_v56, 0.0  ;;  %v1066_v15 = vsel %vm994_vm10, %v2356_v38, 0.0 }
 0x162   : >> { %v1128_v18 = vadd.f32 %v1064_v24, %v920_v31  ;;  %v1130_v36 = vadd.f32 %v1066_v15, %v922_v11  ;;  %vm1200_vm11 = vcmp.eq.f32.partialorder %v797_v35, %v2359_v58  ;;  %vm1344_vm12 = vcmp.eq.f32.partialorder %v797_v35, %v2367_v62 }
 0x163   : >> { %1633 = vmatpush1.bf16.msra.mxu0 %v1595_v14  ;;  %vm1202_vm13 = vcmp.eq.f32.partialorder %v798_v46, %v2359_v58  ;;  %v1272_v47 = vsel %vm1200_vm11, %v2363_v59, 0.0  ;;  %vm1346_vm14 = vcmp.eq.f32.partialorder %v798_v46, %v2367_v62  ;;  %v1416_v12 = vsel %vm1344_vm12, %v2370_v63, 0.0 }
 0x164   : >> { %v1274_v21 = vsel %vm1202_vm13, %v2363_v59, 0.0  ;;  %v1418_v51 = vsel %vm1346_vm14, %v2370_v63, 0.0  ;;  %v1480_v10 = vadd.f32 %v1416_v12, %v1272_v47  ;;  %vm849_vm15 = vcmp.eq.f32.partialorder %v734_v9, %v2373_v0 }
 0x165   : >> { %v1482_v61 = vadd.f32 %v1418_v51, %v1274_v21  ;;  %v919_v17 = vsel %vm847_vm7, %v2377_v1, 0.0  ;;  %v921_v41 = vsel %vm849_vm15, %v2377_v1, 0.0  ;;  %vm993_vm0 = vcmp.eq.f32.partialorder %v734_v9, %v2381_v2 }
 0x166   : >> { %v1544_v55 = vmul.f32 %v1480_v10, %v1128_v18  ;;  %v1063_v42 = vsel %vm991_vm8, %v2384_v3, 0.0  ;;  %v1065_v23 = vsel %vm993_vm0, %v2384_v3, 0.0  ;;  %vm1199_vm1 = vcmp.eq.f32.partialorder %v797_v35, %v2387_v5 }
 0x167   : >> { %v1546_v16 = vmul.f32 %v1482_v61, %v1130_v36  ;;  %v1127_v19 = vadd.f32 %v1063_v42, %v919_v17  ;;  %v1129_v22 = vadd.f32 %v1065_v23, %v921_v41  ;;  %vm1201_vm2 = vcmp.eq.f32.partialorder %v798_v46, %v2387_v5 }
 0x168   : >> { %v1271_v4 = vsel %vm1199_vm1, %v2391_v6, 0.0  ;;  %v1273_v31 = vsel %vm1201_vm2, %v2391_v6, 0.0  ;;  %vm1343_vm3 = vcmp.eq.f32.partialorder %v797_v35, %v2395_v7  ;;  %vm1345_vm4 = vcmp.eq.f32.partialorder %v798_v46, %v2395_v7 }
 0x169   : >> { %v1598_v9 = vpack.c.bf16 %v1546_v16, %v1544_v55  ;;  %v1415_v13 = vsel %vm1343_vm3, %v2398_v8, 0.0  ;;  %v1417_v24 = vsel %vm1345_vm4, %v2398_v8, 0.0  ;;  %v672_v14 = vadd.f32 0.5, %v640_v20 }
 0x16a   : >> { %v1479_v11 = vadd.f32 %v1415_v13, %v1271_v4  ;;  %v1481_v15 = vadd.f32 %v1417_v24, %v1273_v31  ;;  %v703_v18 = vmul.f32 0.0625, %v671_v52  ;;  %v2697_v36 = vadd.s32 %v2336_v50, %v2614_v48 }
 0x16b   : >> { %1634 = vmatprep.subr.bf16.mxu0 %v1598_v9  ;;  %v704_v47 = vmul.f32 0.0625, %v672_v14  ;;  %v641_v35 = vcvt.s32.f32 %v2617_v54  ;;  %v578_v46 = vadd.s32 128, %v2329_v45  ;;  %v579_v12 = vadd.s32 136, %v2329_v45 }
 0x16c   : >> { %v1543_v21 = vmul.f32 %v1479_v11, %v1127_v19  ;;  %v1545_v51 = vmul.f32 %v1481_v15, %v1129_v22  ;;  %v735_v10 = vfloor.f32 %v703_v18  ;;  %v642_v61 = vcvt.s32.f32 %v2697_v36 }
 0x16d   : >> { %v736_v17 = vfloor.f32 %v704_v47  ;;  %v673_v52 = vadd.f32 0.5, %v641_v35  ;;  %v2706_v48 = vadd.s32 %v2336_v50, %v578_v46  ;;  %v2709_v41 = vadd.s32 %v2336_v50, %v579_v12 }
 0x16e   : >> { %v1597_v55 = vpack.c.bf16 %v1545_v51, %v1543_v21  ;;  %v767_v42 = vmul.f32 16.0, %v735_v10  ;;  %vm852_vm5 = vcmp.eq.f32.partialorder %v735_v10, %v2345_v37  ;;  %vm996_vm6 = vcmp.eq.f32.partialorder %v735_v10, %v2353_v57 }
 0x16f   : >> { %v768_v23 = vmul.f32 16.0, %v736_v17  ;;  %vm854_vm7 = vcmp.eq.f32.partialorder %v736_v17, %v2345_v37  ;;  %v924_v16 = vsel %vm852_vm5, %v2349_v56, 0.0  ;;  %vm998_vm8 = vcmp.eq.f32.partialorder %v736_v17, %v2353_v57 }
 0x170   : >> { %1635 = vmatpush1.bf16.msra.mxu0 %v1597_v55  ;;  %v799_v19 = vsub.f32 %v639_v60, %v767_v42  ;;  %v926_v22 = vsel %vm854_vm7, %v2349_v56, 0.0  ;;  %v1068_v4 = vsel %vm996_vm6, %v2356_v38, 0.0  ;;  %v1070_v31 = vsel %vm998_vm8, %v2356_v38, 0.0 }
 0x171   : >> { %v800_v9 = vsub.f32 %v640_v20, %v768_v23  ;;  %v1132_v13 = vadd.f32 %v1068_v4, %v924_v16  ;;  %v1134_v24 = vadd.f32 %v1070_v31, %v926_v22  ;;  %vm851_vm9 = vcmp.eq.f32.partialorder %v735_v10, %v2373_v0 }
 0x172   : >> { %vm1204_vm10 = vcmp.eq.f32.partialorder %v799_v19, %v2359_v58  ;;  %vm1348_vm11 = vcmp.eq.f32.partialorder %v799_v19, %v2367_v62  ;;  %vm853_vm12 = vcmp.eq.f32.partialorder %v736_v17, %v2373_v0  ;;  %v923_v49 = vsel %vm851_vm9, %v2377_v1, 0.0 }
 0x173   : >> { %vm1206_vm13 = vcmp.eq.f32.partialorder %v800_v9, %v2359_v58  ;;  %v1276_v60 = vsel %vm1204_vm10, %v2363_v59, 0.0  ;;  %vm1350_vm14 = vcmp.eq.f32.partialorder %v800_v9, %v2367_v62  ;;  %v1420_v53 = vsel %vm1348_vm11, %v2370_v63, 0.0 }
 0x174   : >> { %v1278_v20 = vsel %vm1206_vm13, %v2363_v59, 0.0  ;;  %v1422_v14 = vsel %vm1350_vm14, %v2370_v63, 0.0  ;;  %v1484_v11 = vadd.f32 %v1420_v53, %v1276_v60  ;;  %v925_v15 = vsel %vm853_vm12, %v2377_v1, 0.0 }
 0x175   : >> { %v1486_v18 = vadd.f32 %v1422_v14, %v1278_v20  ;;  %vm995_vm15 = vcmp.eq.f32.partialorder %v735_v10, %v2381_v2  ;;  %vm997_vm0 = vcmp.eq.f32.partialorder %v736_v17, %v2381_v2  ;;  %vm1203_vm1 = vcmp.eq.f32.partialorder %v799_v19, %v2387_v5 }
 0x176   : >> { %v1548_v47 = vmul.f32 %v1484_v11, %v1132_v13  ;;  %v1067_v46 = vsel %vm995_vm15, %v2384_v3, 0.0  ;;  %v1069_v12 = vsel %vm997_vm0, %v2384_v3, 0.0  ;;  %vm1205_vm2 = vcmp.eq.f32.partialorder %v800_v9, %v2387_v5 }
 0x177   : >> { %v1550_v21 = vmul.f32 %v1486_v18, %v1134_v24  ;;  %v1131_v51 = vadd.f32 %v1067_v46, %v923_v49  ;;  %v1133_v55 = vadd.f32 %v1069_v12, %v925_v15  ;;  %v1275_v42 = vsel %vm1203_vm1, %v2391_v6, 0.0 }
 0x178   : >> { %v1277_v23 = vsel %vm1205_vm2, %v2391_v6, 0.0  ;;  %vm1347_vm3 = vcmp.eq.f32.partialorder %v799_v19, %v2395_v7  ;;  %vm1349_vm4 = vcmp.eq.f32.partialorder %v800_v9, %v2395_v7  ;;  %v674_v10 = vadd.f32 0.5, %v642_v61 }
 0x179   : >> { %v1600_v17 = vpack.c.bf16 %v1550_v21, %v1548_v47  ;;  %v1419_v16 = vsel %vm1347_vm3, %v2398_v8, 0.0  ;;  %v1421_v22 = vsel %vm1349_vm4, %v2398_v8, 0.0  ;;  %v705_v4 = vmul.f32 0.0625, %v673_v52 }
 0x17a   : >> { %v1483_v31 = vadd.f32 %v1419_v16, %v1275_v42  ;;  %v1485_v13 = vadd.f32 %v1421_v22, %v1277_v23  ;;  %v706_v24 = vmul.f32 0.0625, %v674_v10  ;;  %v643_v49 = vcvt.s32.f32 %v2706_v48 }
 0x17b   : >> { %1636 = vmatprep.subr.bf16.mxu0 %v1600_v17  ;;  %v737_v60 = vfloor.f32 %v705_v4  ;;  %v644_v19 = vcvt.s32.f32 %v2709_v41  ;;  %v580_v9 = vadd.s32 144, %v2329_v45  ;;  %v581_v53 = vadd.s32 152, %v2329_v45 }
 0x17c   : >> { %v1547_v20 = vmul.f32 %v1483_v31, %v1131_v51  ;;  %v1549_v14 = vmul.f32 %v1485_v13, %v1133_v55  ;;  %v738_v11 = vfloor.f32 %v706_v24  ;;  %v675_v15 = vadd.f32 0.5, %v643_v49 }
 0x17d   : >> { %v769_v52 = vmul.f32 16.0, %v737_v60  ;;  %vm856_vm5 = vcmp.eq.f32.partialorder %v737_v60, %v2345_v37  ;;  %vm1000_vm6 = vcmp.eq.f32.partialorder %v737_v60, %v2353_v57  ;;  %vm855_vm7 = vcmp.eq.f32.partialorder %v737_v60, %v2373_v0 }
 0x17e   : >> { %v1599_v18 = vpack.c.bf16 %v1549_v14, %v1547_v20  ;;  %v770_v47 = vmul.f32 16.0, %v738_v11  ;;  %vm858_vm8 = vcmp.eq.f32.partialorder %v738_v11, %v2345_v37  ;;  %v928_v46 = vsel %vm856_vm5, %v2349_v56, 0.0 }
 0x17f   : >> { %v801_v12 = vsub.f32 %v641_v35, %v769_v52  ;;  %v930_v21 = vsel %vm858_vm8, %v2349_v56, 0.0  ;;  %vm1002_vm9 = vcmp.eq.f32.partialorder %v738_v11, %v2353_v57  ;;  %v1072_v51 = vsel %vm1000_vm6, %v2356_v38, 0.0 }
 0x180   : >> { %1637 = vmatpush1.bf16.msra.mxu0 %v1599_v18  ;;  %v802_v55 = vsub.f32 %v642_v61, %v770_v47  ;;  %v1074_v42 = vsel %vm1002_vm9, %v2356_v38, 0.0  ;;  %v1136_v23 = vadd.f32 %v1072_v51, %v928_v46  ;;  %vm857_vm10 = vcmp.eq.f32.partialorder %v738_v11, %v2373_v0 }
 0x181   : >> { %v1138_v10 = vadd.f32 %v1074_v42, %v930_v21  ;;  %vm1208_vm11 = vcmp.eq.f32.partialorder %v801_v12, %v2359_v58  ;;  %vm1352_vm12 = vcmp.eq.f32.partialorder %v801_v12, %v2367_v62  ;;  %v927_v54 = vsel %vm855_vm7, %v2377_v1, 0.0 }
 0x182   : >> { %vm1210_vm13 = vcmp.eq.f32.partialorder %v802_v55, %v2359_v58  ;;  %v1280_v35 = vsel %vm1208_vm11, %v2363_v59, 0.0  ;;  %vm1354_vm14 = vcmp.eq.f32.partialorder %v802_v55, %v2367_v62  ;;  %v1424_v36 = vsel %vm1352_vm12, %v2370_v63, 0.0 }
 0x183   : >> { %v1282_v61 = vsel %vm1210_vm13, %v2363_v59, 0.0  ;;  %v1426_v17 = vsel %vm1354_vm14, %v2370_v63, 0.0  ;;  %v1488_v16 = vadd.f32 %v1424_v36, %v1280_v35  ;;  %v929_v22 = vsel %vm857_vm10, %v2377_v1, 0.0 }
 0x184   : >> { %v1490_v4 = vadd.f32 %v1426_v17, %v1282_v61  ;;  %vm999_vm15 = vcmp.eq.f32.partialorder %v737_v60, %v2381_v2  ;;  %vm1001_vm0 = vcmp.eq.f32.partialorder %v738_v11, %v2381_v2  ;;  %vm1207_vm1 = vcmp.eq.f32.partialorder %v801_v12, %v2387_v5 }
 0x185   : >> { %v1552_v31 = vmul.f32 %v1488_v16, %v1136_v23  ;;  %v1071_v13 = vsel %vm999_vm15, %v2384_v3, 0.0  ;;  %v1073_v24 = vsel %vm1001_vm0, %v2384_v3, 0.0  ;;  %vm1209_vm2 = vcmp.eq.f32.partialorder %v802_v55, %v2387_v5 }
 0x186   : >> { %v1554_v20 = vmul.f32 %v1490_v4, %v1138_v10  ;;  %v1135_v14 = vadd.f32 %v1071_v13, %v927_v54  ;;  %v1137_v52 = vadd.f32 %v1073_v24, %v929_v22  ;;  %v1279_v18 = vsel %vm1207_vm1, %v2391_v6, 0.0 }
 0x187   : >> { %v1281_v47 = vsel %vm1209_vm2, %v2391_v6, 0.0  ;;  %vm1351_vm3 = vcmp.eq.f32.partialorder %v801_v12, %v2395_v7  ;;  %vm1353_vm4 = vcmp.eq.f32.partialorder %v802_v55, %v2395_v7  ;;  %v676_v60 = vadd.f32 0.5, %v644_v19 }
 0x188   : >> { %v1602_v11 = vpack.c.bf16 %v1554_v20, %v1552_v31  ;;  %v1423_v46 = vsel %vm1351_vm3, %v2398_v8, 0.0  ;;  %v1425_v21 = vsel %vm1353_vm4, %v2398_v8, 0.0  ;;  %v707_v51 = vmul.f32 0.0625, %v675_v15 }
 0x189   : >> { %v1487_v42 = vadd.f32 %v1423_v46, %v1279_v18  ;;  %v1489_v23 = vadd.f32 %v1425_v21, %v1281_v47  ;;  %v708_v10 = vmul.f32 0.0625, %v676_v60  ;;  %v2796_v54 = vadd.s32 %v2336_v50, %v580_v9 }
 0x18a   : >> { %1638 = vmatprep.subr.bf16.mxu0 %v1602_v11  ;;  %v739_v35 = vfloor.f32 %v707_v51  ;;  %v2799_v12 = vadd.s32 %v2336_v50, %v581_v53  ;;  %v582_v55 = vadd.s32 160, %v2329_v45  ;;  %v583_v36 = vadd.s32 168, %v2329_v45 }
 0x18b   : >> { %v1551_v61 = vmul.f32 %v1487_v42, %v1135_v14  ;;  %v1553_v17 = vmul.f32 %v1489_v23, %v1137_v52  ;;  %v740_v16 = vfloor.f32 %v708_v10  ;;  %v645_v15 = vcvt.s32.f32 %v2796_v54 }
 0x18c   : >> { %v771_v22 = vmul.f32 16.0, %v739_v35  ;;  %vm860_vm5 = vcmp.eq.f32.partialorder %v739_v35, %v2345_v37  ;;  %vm1004_vm6 = vcmp.eq.f32.partialorder %v739_v35, %v2353_v57  ;;  %vm859_vm7 = vcmp.eq.f32.partialorder %v739_v35, %v2373_v0 }
 0x18d   : >> { %v1601_v9 = vpack.c.bf16 %v1553_v17, %v1551_v61  ;;  %v772_v4 = vmul.f32 16.0, %v740_v16  ;;  %vm862_vm8 = vcmp.eq.f32.partialorder %v740_v16, %v2345_v37  ;;  %v932_v53 = vsel %vm860_vm5, %v2349_v56, 0.0 }
 0x18e   : >> { %v803_v31 = vsub.f32 %v643_v49, %v771_v22  ;;  %v934_v13 = vsel %vm862_vm8, %v2349_v56, 0.0  ;;  %vm1006_vm9 = vcmp.eq.f32.partialorder %v740_v16, %v2353_v57  ;;  %v1076_v24 = vsel %vm1004_vm6, %v2356_v38, 0.0 }
 0x18f   : >> { %1639 = vmatpush1.bf16.msra.mxu0 %v1601_v9  ;;  %v804_v20 = vsub.f32 %v644_v19, %v772_v4  ;;  %v1078_v14 = vsel %vm1006_vm9, %v2356_v38, 0.0  ;;  %v1140_v52 = vadd.f32 %v1076_v24, %v932_v53  ;;  %vm861_vm10 = vcmp.eq.f32.partialorder %v740_v16, %v2373_v0 }
 0x190   : >> { %v1142_v18 = vadd.f32 %v1078_v14, %v934_v13  ;;  %vm1212_vm11 = vcmp.eq.f32.partialorder %v803_v31, %v2359_v58  ;;  %vm1356_vm12 = vcmp.eq.f32.partialorder %v803_v31, %v2367_v62  ;;  %v931_v48 = vsel %vm859_vm7, %v2377_v1, 0.0 }
 0x191   : >> { %vm1214_vm13 = vcmp.eq.f32.partialorder %v804_v20, %v2359_v58  ;;  %v1284_v49 = vsel %vm1212_vm11, %v2363_v59, 0.0  ;;  %vm1358_vm14 = vcmp.eq.f32.partialorder %v804_v20, %v2367_v62  ;;  %v1428_v41 = vsel %vm1356_vm12, %v2370_v63, 0.0 }
 0x192   : >> { %v1286_v19 = vsel %vm1214_vm13, %v2363_v59, 0.0  ;;  %v1430_v47 = vsel %vm1358_vm14, %v2370_v63, 0.0  ;;  %v1492_v60 = vadd.f32 %v1428_v41, %v1284_v49  ;;  %v933_v11 = vsel %vm861_vm10, %v2377_v1, 0.0 }
 0x193   : >> { %v1494_v46 = vadd.f32 %v1430_v47, %v1286_v19  ;;  %vm1003_vm15 = vcmp.eq.f32.partialorder %v739_v35, %v2381_v2  ;;  %vm1005_vm0 = vcmp.eq.f32.partialorder %v740_v16, %v2381_v2  ;;  %vm1211_vm1 = vcmp.eq.f32.partialorder %v803_v31, %v2387_v5 }
 0x194   : >> { %v1556_v21 = vmul.f32 %v1492_v60, %v1140_v52  ;;  %v1075_v51 = vsel %vm1003_vm15, %v2384_v3, 0.0  ;;  %v1077_v42 = vsel %vm1005_vm0, %v2384_v3, 0.0  ;;  %vm1213_vm2 = vcmp.eq.f32.partialorder %v804_v20, %v2387_v5 }
 0x195   : >> { %v1558_v23 = vmul.f32 %v1494_v46, %v1142_v18  ;;  %v1139_v10 = vadd.f32 %v1075_v51, %v931_v48  ;;  %v1141_v61 = vadd.f32 %v1077_v42, %v933_v11  ;;  %v1283_v17 = vsel %vm1211_vm1, %v2391_v6, 0.0 }
 0x196   : >> { %v1285_v22 = vsel %vm1213_vm2, %v2391_v6, 0.0  ;;  %vm1355_vm3 = vcmp.eq.f32.partialorder %v803_v31, %v2395_v7  ;;  %vm1357_vm4 = vcmp.eq.f32.partialorder %v804_v20, %v2395_v7  ;;  %v646_v35 = vcvt.s32.f32 %v2799_v12 }
 0x197   : >> { %v1604_v16 = vpack.c.bf16 %v1558_v23, %v1556_v21  ;;  %v1427_v9 = vsel %vm1355_vm3, %v2398_v8, 0.0  ;;  %v1429_v4 = vsel %vm1357_vm4, %v2398_v8, 0.0  ;;  %v677_v53 = vadd.f32 0.5, %v645_v15 }
 0x198   : >> { %v1491_v13 = vadd.f32 %v1427_v9, %v1283_v17  ;;  %v1493_v24 = vadd.f32 %v1429_v4, %v1285_v22  ;;  %v678_v14 = vadd.f32 0.5, %v646_v35  ;;  %v2846_v52 = vadd.s32 %v2336_v50, %v582_v55 }
 0x199   : >> { %1640 = vmatprep.subr.bf16.mxu0 %v1604_v16  ;;  %v709_v31 = vmul.f32 0.0625, %v677_v53  ;;  %v2849_v20 = vadd.s32 %v2336_v50, %v583_v36  ;;  %v584_v12 = vadd.s32 176, %v2329_v45  ;;  %v585_v18 = vadd.s32 184, %v2329_v45 }
 0x19a   : >> { %v1555_v48 = vmul.f32 %v1491_v13, %v1139_v10  ;;  %v1557_v49 = vmul.f32 %v1493_v24, %v1141_v61  ;;  %v710_v41 = vmul.f32 0.0625, %v678_v14  ;;  %v647_v19 = vcvt.s32.f32 %v2846_v52 }
 0x19b   : >> { %v741_v47 = vfloor.f32 %v709_v31  ;;  %v648_v60 = vcvt.s32.f32 %v2849_v20  ;;  %v2856_v55 = vadd.s32 %v2336_v50, %v584_v12  ;;  %v2859_v11 = vadd.s32 %v2336_v50, %v585_v18 }
 0x19c   : >> { %v1603_v36 = vpack.c.bf16 %v1557_v49, %v1555_v48  ;;  %v742_v46 = vfloor.f32 %v710_v41  ;;  %v679_v21 = vadd.f32 0.5, %v647_v19  ;;  %v586_v51 = vadd.s32 192, %v2329_v45 }
 0x19d   : >> { %v773_v42 = vmul.f32 16.0, %v741_v47  ;;  %vm864_vm5 = vcmp.eq.f32.partialorder %v741_v47, %v2345_v37  ;;  %vm1008_vm6 = vcmp.eq.f32.partialorder %v741_v47, %v2353_v57  ;;  %vm863_vm7 = vcmp.eq.f32.partialorder %v741_v47, %v2373_v0 }
 0x19e   : >> { %1641 = vmatpush1.bf16.msra.mxu0 %v1603_v36  ;;  %v774_v23 = vmul.f32 16.0, %v742_v46  ;;  %vm866_vm8 = vcmp.eq.f32.partialorder %v742_v46, %v2345_v37  ;;  %v936_v10 = vsel %vm864_vm5, %v2349_v56, 0.0  ;;  %vm1010_vm9 = vcmp.eq.f32.partialorder %v742_v46, %v2353_v57 }
 0x19f   : >> { %v805_v61 = vsub.f32 %v645_v15, %v773_v42  ;;  %v938_v17 = vsel %vm866_vm8, %v2349_v56, 0.0  ;;  %v1080_v22 = vsel %vm1008_vm6, %v2356_v38, 0.0  ;;  %v1082_v16 = vsel %vm1010_vm9, %v2356_v38, 0.0 }
 0x1a0   : >> { %v806_v9 = vsub.f32 %v646_v35, %v774_v23  ;;  %v1144_v4 = vadd.f32 %v1080_v22, %v936_v10  ;;  %v1146_v53 = vadd.f32 %v1082_v16, %v938_v17  ;;  %vm865_vm10 = vcmp.eq.f32.partialorder %v742_v46, %v2373_v0 }
 0x1a1   : >> { %vm1216_vm11 = vcmp.eq.f32.partialorder %v805_v61, %v2359_v58  ;;  %vm1360_vm12 = vcmp.eq.f32.partialorder %v805_v61, %v2367_v62  ;;  %v935_v54 = vsel %vm863_vm7, %v2377_v1, 0.0  ;;  %v937_v15 = vsel %vm865_vm10, %v2377_v1, 0.0 }
 0x1a2   : >> { %vm1218_vm13 = vcmp.eq.f32.partialorder %v806_v9, %v2359_v58  ;;  %v1288_v13 = vsel %vm1216_vm11, %v2363_v59, 0.0  ;;  %vm1362_vm14 = vcmp.eq.f32.partialorder %v806_v9, %v2367_v62  ;;  %v1432_v35 = vsel %vm1360_vm12, %v2370_v63, 0.0 }
 0x1a3   : >> { %v1290_v24 = vsel %vm1218_vm13, %v2363_v59, 0.0  ;;  %v1434_v14 = vsel %vm1362_vm14, %v2370_v63, 0.0  ;;  %v1496_v31 = vadd.f32 %v1432_v35, %v1288_v13  ;;  %vm1007_vm15 = vcmp.eq.f32.partialorder %v741_v47, %v2381_v2 }
 0x1a4   : >> { %v1498_v12 = vadd.f32 %v1434_v14, %v1290_v24  ;;  %vm1009_vm0 = vcmp.eq.f32.partialorder %v742_v46, %v2381_v2  ;;  %v1079_v18 = vsel %vm1007_vm15, %v2384_v3, 0.0  ;;  %vm1215_vm1 = vcmp.eq.f32.partialorder %v805_v61, %v2387_v5 }
 0x1a5   : >> { %v1560_v48 = vmul.f32 %v1496_v31, %v1144_v4  ;;  %v1081_v49 = vsel %vm1009_vm0, %v2384_v3, 0.0  ;;  %v1143_v41 = vadd.f32 %v1079_v18, %v935_v54  ;;  %vm1217_vm2 = vcmp.eq.f32.partialorder %v806_v9, %v2387_v5 }
 0x1a6   : >> { %v1562_v36 = vmul.f32 %v1498_v12, %v1146_v53  ;;  %v1145_v42 = vadd.f32 %v1081_v49, %v937_v15  ;;  %v1287_v23 = vsel %vm1215_vm1, %v2391_v6, 0.0  ;;  %v1289_v10 = vsel %vm1217_vm2, %v2391_v6, 0.0 }
 0x1a7   : >> { %vm1359_vm3 = vcmp.eq.f32.partialorder %v805_v61, %v2395_v7  ;;  %vm1361_vm4 = vcmp.eq.f32.partialorder %v806_v9, %v2395_v7  ;;  %v680_v47 = vadd.f32 0.5, %v648_v60  ;;  %v711_v46 = vmul.f32 0.0625, %v679_v21 }
 0x1a8   : >> { %v1606_v17 = vpack.c.bf16 %v1562_v36, %v1560_v48  ;;  %v1431_v22 = vsel %vm1359_vm3, %v2398_v8, 0.0  ;;  %v1433_v16 = vsel %vm1361_vm4, %v2398_v8, 0.0  ;;  %v649_v4 = vcvt.s32.f32 %v2856_v55 }
 0x1a9   : >> { %v1495_v53 = vadd.f32 %v1431_v22, %v1287_v23  ;;  %v1497_v54 = vadd.f32 %v1433_v16, %v1289_v10  ;;  %v712_v15 = vmul.f32 0.0625, %v680_v47  ;;  %v743_v13 = vfloor.f32 %v711_v46 }
 0x1aa   : >> { %1642 = vmatprep.subr.bf16.mxu0 %v1606_v17  ;;  %v650_v61 = vcvt.s32.f32 %v2859_v11  ;;  %v681_v9 = vadd.f32 0.5, %v649_v4  ;;  %v587_v35 = vadd.s32 200, %v2329_v45  ;;  %v2908_v21 = vadd.s32 %v2336_v50, %v586_v51 }
 0x1ab   : >> { %v1559_v24 = vmul.f32 %v1495_v53, %v1143_v41  ;;  %v1561_v14 = vmul.f32 %v1497_v54, %v1145_v42  ;;  %v744_v31 = vfloor.f32 %v712_v15  ;;  %v775_v12 = vmul.f32 16.0, %v743_v13 }
 0x1ac   : >> { %vm868_vm5 = vcmp.eq.f32.partialorder %v743_v13, %v2345_v37  ;;  %vm1012_vm6 = vcmp.eq.f32.partialorder %v743_v13, %v2353_v57  ;;  %vm867_vm7 = vcmp.eq.f32.partialorder %v743_v13, %v2373_v0  ;;  %vm1011_vm8 = vcmp.eq.f32.partialorder %v743_v13, %v2381_v2 }
 0x1ad   : >> { %v1605_v18 = vpack.c.bf16 %v1561_v14, %v1559_v24  ;;  %v776_v48 = vmul.f32 16.0, %v744_v31  ;;  %v807_v49 = vsub.f32 %v647_v19, %v775_v12  ;;  %vm870_vm9 = vcmp.eq.f32.partialorder %v744_v31, %v2345_v37 }
 0x1ae   : >> { %v940_v51 = vsel %vm868_vm5, %v2349_v56, 0.0  ;;  %v942_v41 = vsel %vm870_vm9, %v2349_v56, 0.0  ;;  %vm1014_vm10 = vcmp.eq.f32.partialorder %v744_v31, %v2353_v57  ;;  %v1084_v36 = vsel %vm1012_vm6, %v2356_v38, 0.0 }
 0x1af   : >> { %1643 = vmatpush1.bf16.msra.mxu0 %v1605_v18  ;;  %v808_v42 = vsub.f32 %v648_v60, %v776_v48  ;;  %v1086_v23 = vsel %vm1014_vm10, %v2356_v38, 0.0  ;;  %v1148_v10 = vadd.f32 %v1084_v36, %v940_v51  ;;  %vm1220_vm11 = vcmp.eq.f32.partialorder %v807_v49, %v2359_v58 }
 0x1b0   : >> { %v1150_v52 = vadd.f32 %v1086_v23, %v942_v41  ;;  %v1292_v19 = vsel %vm1220_vm11, %v2363_v59, 0.0  ;;  %vm1364_vm12 = vcmp.eq.f32.partialorder %v807_v49, %v2367_v62  ;;  %vm869_vm13 = vcmp.eq.f32.partialorder %v744_v31, %v2373_v0 }
 0x1b1   : >> { %vm1222_vm14 = vcmp.eq.f32.partialorder %v808_v42, %v2359_v58  ;;  %vm1366_vm15 = vcmp.eq.f32.partialorder %v808_v42, %v2367_v62  ;;  %v1436_v47 = vsel %vm1364_vm12, %v2370_v63, 0.0  ;;  %v939_v20 = vsel %vm867_vm7, %v2377_v1, 0.0 }
 0x1b2   : >> { %v1294_v60 = vsel %vm1222_vm14, %v2363_v59, 0.0  ;;  %v1438_v46 = vsel %vm1366_vm15, %v2370_v63, 0.0  ;;  %v1500_v17 = vadd.f32 %v1436_v47, %v1292_v19  ;;  %v941_v22 = vsel %vm869_vm13, %v2377_v1, 0.0 }
 0x1b3   : >> { %v1502_v16 = vadd.f32 %v1438_v46, %v1294_v60  ;;  %vm1013_vm0 = vcmp.eq.f32.partialorder %v744_v31, %v2381_v2  ;;  %v1083_v53 = vsel %vm1011_vm8, %v2384_v3, 0.0  ;;  %vm1219_vm1 = vcmp.eq.f32.partialorder %v807_v49, %v2387_v5 }
 0x1b4   : >> { %v1564_v54 = vmul.f32 %v1500_v17, %v1148_v10  ;;  %v1085_v15 = vsel %vm1013_vm0, %v2384_v3, 0.0  ;;  %v1147_v24 = vadd.f32 %v1083_v53, %v939_v20  ;;  %vm1221_vm2 = vcmp.eq.f32.partialorder %v808_v42, %v2387_v5 }
 0x1b5   : >> { %v1566_v14 = vmul.f32 %v1502_v16, %v1150_v52  ;;  %v1149_v12 = vadd.f32 %v1085_v15, %v941_v22  ;;  %v1291_v18 = vsel %vm1219_vm1, %v2391_v6, 0.0  ;;  %v1293_v48 = vsel %vm1221_vm2, %v2391_v6, 0.0 }
 0x1b6   : >> { %vm1363_vm3 = vcmp.eq.f32.partialorder %v807_v49, %v2395_v7  ;;  %vm1365_vm4 = vcmp.eq.f32.partialorder %v808_v42, %v2395_v7  ;;  %v682_v13 = vadd.f32 0.5, %v650_v61  ;;  %v713_v31 = vmul.f32 0.0625, %v681_v9 }
 0x1b7   : >> { %v1608_v51 = vpack.c.bf16 %v1566_v14, %v1564_v54  ;;  %v1435_v41 = vsel %vm1363_vm3, %v2398_v8, 0.0  ;;  %v1437_v36 = vsel %vm1365_vm4, %v2398_v8, 0.0  ;;  %v2953_v23 = vadd.s32 %v2336_v50, %v587_v35 }
 0x1b8   : >> { %v1499_v10 = vadd.f32 %v1435_v41, %v1291_v18  ;;  %v1501_v52 = vadd.f32 %v1437_v36, %v1293_v48  ;;  %v714_v19 = vmul.f32 0.0625, %v682_v13  ;;  %v745_v47 = vfloor.f32 %v713_v31 }
 0x1b9   : >> { %1644 = vmatprep.subr.bf16.mxu0 %v1608_v51  ;;  %v651_v49 = vcvt.s32.f32 %v2908_v21  ;;  %v652_v42 = vcvt.s32.f32 %v2953_v23  ;;  %v588_v20 = vadd.s32 208, %v2329_v45  ;;  %v589_v9 = vadd.s32 216, %v2329_v45 }
 0x1ba   : >> { %v1563_v60 = vmul.f32 %v1499_v10, %v1147_v24  ;;  %v1565_v46 = vmul.f32 %v1501_v52, %v1149_v12  ;;  %v746_v17 = vfloor.f32 %v714_v19  ;;  %v777_v22 = vmul.f32 16.0, %v745_v47 }
 0x1bb   : >> { %vm872_vm5 = vcmp.eq.f32.partialorder %v745_v47, %v2345_v37  ;;  %vm1016_vm6 = vcmp.eq.f32.partialorder %v745_v47, %v2353_v57  ;;  %vm871_vm7 = vcmp.eq.f32.partialorder %v745_v47, %v2373_v0  ;;  %vm1015_vm8 = vcmp.eq.f32.partialorder %v745_v47, %v2381_v2 }
 0x1bc   : >> { %v1607_v35 = vpack.c.bf16 %v1565_v46, %v1563_v60  ;;  %v778_v16 = vmul.f32 16.0, %v746_v17  ;;  %v809_v53 = vsub.f32 %v649_v4, %v777_v22  ;;  %vm874_vm9 = vcmp.eq.f32.partialorder %v746_v17, %v2345_v37 }
 0x1bd   : >> { %v944_v54 = vsel %vm872_vm5, %v2349_v56, 0.0  ;;  %v946_v15 = vsel %vm874_vm9, %v2349_v56, 0.0  ;;  %vm1018_vm10 = vcmp.eq.f32.partialorder %v746_v17, %v2353_v57  ;;  %v1088_v24 = vsel %vm1016_vm6, %v2356_v38, 0.0 }
 0x1be   : >> { %1645 = vmatpush1.bf16.msra.mxu0 %v1607_v35  ;;  %v810_v14 = vsub.f32 %v650_v61, %v778_v16  ;;  %v1090_v12 = vsel %vm1018_vm10, %v2356_v38, 0.0  ;;  %v1152_v18 = vadd.f32 %v1088_v24, %v944_v54  ;;  %vm1224_vm11 = vcmp.eq.f32.partialorder %v809_v53, %v2359_v58 }
 0x1bf   : >> { %v1154_v55 = vadd.f32 %v1090_v12, %v946_v15  ;;  %v1296_v4 = vsel %vm1224_vm11, %v2363_v59, 0.0  ;;  %vm1368_vm12 = vcmp.eq.f32.partialorder %v809_v53, %v2367_v62  ;;  %vm873_vm13 = vcmp.eq.f32.partialorder %v746_v17, %v2373_v0 }
 0x1c0   : >> { %vm1226_vm14 = vcmp.eq.f32.partialorder %v810_v14, %v2359_v58  ;;  %vm1370_vm15 = vcmp.eq.f32.partialorder %v810_v14, %v2367_v62  ;;  %v1440_v48 = vsel %vm1368_vm12, %v2370_v63, 0.0  ;;  %v943_v11 = vsel %vm871_vm7, %v2377_v1, 0.0 }
 0x1c1   : >> { %v1298_v61 = vsel %vm1226_vm14, %v2363_v59, 0.0  ;;  %v1442_v13 = vsel %vm1370_vm15, %v2370_v63, 0.0  ;;  %v1504_v31 = vadd.f32 %v1440_v48, %v1296_v4  ;;  %v945_v51 = vsel %vm873_vm13, %v2377_v1, 0.0 }
 0x1c2   : >> { %v1506_v41 = vadd.f32 %v1442_v13, %v1298_v61  ;;  %vm1017_vm0 = vcmp.eq.f32.partialorder %v746_v17, %v2381_v2  ;;  %v1087_v36 = vsel %vm1015_vm8, %v2384_v3, 0.0  ;;  %vm1223_vm1 = vcmp.eq.f32.partialorder %v809_v53, %v2387_v5 }
 0x1c3   : >> { %v1568_v10 = vmul.f32 %v1504_v31, %v1152_v18  ;;  %v1089_v52 = vsel %vm1017_vm0, %v2384_v3, 0.0  ;;  %v1151_v19 = vadd.f32 %v1087_v36, %v943_v11  ;;  %vm1225_vm2 = vcmp.eq.f32.partialorder %v810_v14, %v2387_v5 }
 0x1c4   : >> { %v1570_v60 = vmul.f32 %v1506_v41, %v1154_v55  ;;  %v1153_v46 = vadd.f32 %v1089_v52, %v945_v51  ;;  %v1295_v22 = vsel %vm1223_vm1, %v2391_v6, 0.0  ;;  %v1297_v35 = vsel %vm1225_vm2, %v2391_v6, 0.0 }
 0x1c5   : >> { %vm1367_vm3 = vcmp.eq.f32.partialorder %v809_v53, %v2395_v7  ;;  %vm1369_vm4 = vcmp.eq.f32.partialorder %v810_v14, %v2395_v7  ;;  %v683_v47 = vadd.f32 0.5, %v651_v49  ;;  %v684_v17 = vadd.f32 0.5, %v652_v42 }
 0x1c6   : >> { %v1610_v16 = vpack.c.bf16 %v1570_v60, %v1568_v10  ;;  %v1439_v54 = vsel %vm1367_vm3, %v2398_v8, 0.0  ;;  %v1441_v15 = vsel %vm1369_vm4, %v2398_v8, 0.0  ;;  %v3004_v24 = vadd.s32 %v2336_v50, %v588_v20 }
 0x1c7   : >> { %v1503_v12 = vadd.f32 %v1439_v54, %v1295_v22  ;;  %v1505_v18 = vadd.f32 %v1441_v15, %v1297_v35  ;;  %v715_v55 = vmul.f32 0.0625, %v683_v47  ;;  %v716_v53 = vmul.f32 0.0625, %v684_v17 }
 0x1c8   : >> { %1646 = vmatprep.subr.bf16.mxu0 %v1610_v16  ;;  %v3007_v14 = vadd.s32 %v2336_v50, %v589_v9  ;;  %v653_v4 = vcvt.s32.f32 %v3004_v24  ;;  %v590_v48 = vadd.s32 224, %v2329_v45  ;;  %v591_v11 = vadd.s32 232, %v2329_v45 }
 0x1c9   : >> { %v1567_v61 = vmul.f32 %v1503_v12, %v1151_v19  ;;  %v1569_v13 = vmul.f32 %v1505_v18, %v1153_v46  ;;  %v747_v31 = vfloor.f32 %v715_v55  ;;  %v748_v51 = vfloor.f32 %v716_v53 }
 0x1ca   : >> { %v654_v20 = vcvt.s32.f32 %v3007_v14  ;;  %v685_v41 = vadd.f32 0.5, %v653_v4  ;;  %v3016_v36 = vadd.s32 %v2336_v50, %v590_v48  ;;  %v3019_v9 = vadd.s32 %v2336_v50, %v591_v11 }
 0x1cb   : >> { %v1609_v10 = vpack.c.bf16 %v1569_v13, %v1567_v61  ;;  %v779_v52 = vmul.f32 16.0, %v747_v31  ;;  %v780_v60 = vmul.f32 16.0, %v748_v51  ;;  %vm876_vm5 = vcmp.eq.f32.partialorder %v747_v31, %v2345_v37 }
 0x1cc   : >> { %vm878_vm6 = vcmp.eq.f32.partialorder %v748_v51, %v2345_v37  ;;  %v948_v19 = vsel %vm876_vm5, %v2349_v56, 0.0  ;;  %vm1020_vm7 = vcmp.eq.f32.partialorder %v747_v31, %v2353_v57  ;;  %vm1022_vm8 = vcmp.eq.f32.partialorder %v748_v51, %v2353_v57 }
 0x1cd   : >> { %1647 = vmatpush1.bf16.msra.mxu0 %v1609_v10  ;;  %v811_v46 = vsub.f32 %v651_v49, %v779_v52  ;;  %v812_v22 = vsub.f32 %v652_v42, %v780_v60  ;;  %v950_v35 = vsel %vm878_vm6, %v2349_v56, 0.0  ;;  %v1092_v47 = vsel %vm1020_vm7, %v2356_v38, 0.0 }
 0x1ce   : >> { %v1094_v17 = vsel %vm1022_vm8, %v2356_v38, 0.0  ;;  %v1156_v16 = vadd.f32 %v1092_v47, %v948_v19  ;;  %vm875_vm9 = vcmp.eq.f32.partialorder %v747_v31, %v2373_v0  ;;  %vm877_vm10 = vcmp.eq.f32.partialorder %v748_v51, %v2373_v0 }
 0x1cf   : >> { %v1158_v54 = vadd.f32 %v1094_v17, %v950_v35  ;;  %vm1228_vm11 = vcmp.eq.f32.partialorder %v811_v46, %v2359_v58  ;;  %vm1230_vm12 = vcmp.eq.f32.partialorder %v812_v22, %v2359_v58  ;;  %vm1372_vm13 = vcmp.eq.f32.partialorder %v811_v46, %v2367_v62 }
 0x1d0   : >> { %v1300_v21 = vsel %vm1228_vm11, %v2363_v59, 0.0  ;;  %v1302_v23 = vsel %vm1230_vm12, %v2363_v59, 0.0  ;;  %vm1374_vm14 = vcmp.eq.f32.partialorder %v812_v22, %v2367_v62  ;;  %v1444_v49 = vsel %vm1372_vm13, %v2370_v63, 0.0 }
 0x1d1   : >> { %v1446_v42 = vsel %vm1374_vm14, %v2370_v63, 0.0  ;;  %v1508_v15 = vadd.f32 %v1444_v49, %v1300_v21  ;;  %v947_v12 = vsel %vm875_vm9, %v2377_v1, 0.0  ;;  %v949_v18 = vsel %vm877_vm10, %v2377_v1, 0.0 }
 0x1d2   : >> { %v1510_v55 = vadd.f32 %v1446_v42, %v1302_v23  ;;  %vm1019_vm15 = vcmp.eq.f32.partialorder %v747_v31, %v2381_v2  ;;  %vm1021_vm0 = vcmp.eq.f32.partialorder %v748_v51, %v2381_v2  ;;  %vm1227_vm1 = vcmp.eq.f32.partialorder %v811_v46, %v2387_v5 }
 0x1d3   : >> { %v1572_v53 = vmul.f32 %v1508_v15, %v1156_v16  ;;  %v1091_v48 = vsel %vm1019_vm15, %v2384_v3, 0.0  ;;  %v1093_v11 = vsel %vm1021_vm0, %v2384_v3, 0.0  ;;  %vm1229_vm2 = vcmp.eq.f32.partialorder %v812_v22, %v2387_v5 }
 0x1d4   : >> { %v1574_v61 = vmul.f32 %v1510_v55, %v1158_v54  ;;  %v1155_v13 = vadd.f32 %v1091_v48, %v947_v12  ;;  %v1157_v10 = vadd.f32 %v1093_v11, %v949_v18  ;;  %v1299_v52 = vsel %vm1227_vm1, %v2391_v6, 0.0 }
 0x1d5   : >> { %v1301_v60 = vsel %vm1229_vm2, %v2391_v6, 0.0  ;;  %vm1371_vm3 = vcmp.eq.f32.partialorder %v811_v46, %v2395_v7  ;;  %vm1373_vm4 = vcmp.eq.f32.partialorder %v812_v22, %v2395_v7  ;;  %v686_v31 = vadd.f32 0.5, %v654_v20 }
 0x1d6   : >> { %v1612_v51 = vpack.c.bf16 %v1574_v61, %v1572_v53  ;;  %v1443_v19 = vsel %vm1371_vm3, %v2398_v8, 0.0  ;;  %v1445_v35 = vsel %vm1373_vm4, %v2398_v8, 0.0  ;;  %v717_v47 = vmul.f32 0.0625, %v685_v41 }
 0x1d7   : >> { %v1507_v17 = vadd.f32 %v1443_v19, %v1299_v52  ;;  %v1509_v16 = vadd.f32 %v1445_v35, %v1301_v60  ;;  %v718_v54 = vmul.f32 0.0625, %v686_v31  ;;  %v655_v21 = vcvt.s32.f32 %v3016_v36 }
 0x1d8   : >> { %1648 = vmatprep.subr.bf16.mxu0 %v1612_v51  ;;  %v749_v23 = vfloor.f32 %v717_v47  ;;  %v656_v46 = vcvt.s32.f32 %v3019_v9  ;;  %v592_v22 = vadd.s32 240, %v2329_v45  ;;  %v3063_v49 = vadd.s32 248, %v2329_v45 }
 0x1d9   : >> { %v1571_v42 = vmul.f32 %v1507_v17, %v1155_v13  ;;  %v1573_v15 = vmul.f32 %v1509_v16, %v1157_v10  ;;  %v750_v12 = vfloor.f32 %v718_v54  ;;  %v687_v41 = vadd.f32 0.5, %v655_v21 }
 0x1da   : >> { %v781_v18 = vmul.f32 16.0, %v749_v23  ;;  %vm880_vm5 = vcmp.eq.f32.partialorder %v749_v23, %v2345_v37  ;;  %vm1024_vm6 = vcmp.eq.f32.partialorder %v749_v23, %v2353_v57  ;;  %vm879_vm7 = vcmp.eq.f32.partialorder %v749_v23, %v2373_v0 }
 0x1db   : >> { %v1611_v55 = vpack.c.bf16 %v1573_v15, %v1571_v42  ;;  %v782_v53 = vmul.f32 16.0, %v750_v12  ;;  %vm882_vm8 = vcmp.eq.f32.partialorder %v750_v12, %v2345_v37  ;;  %v952_v45 = vsel %vm880_vm5, %v2349_v56, 0.0 }
 0x1dc   : >> { %v813_v48 = vsub.f32 %v653_v4, %v781_v18  ;;  %v954_v11 = vsel %vm882_vm8, %v2349_v56, 0.0  ;;  %vm1026_vm9 = vcmp.eq.f32.partialorder %v750_v12, %v2353_v57  ;;  %v1096_v61 = vsel %vm1024_vm6, %v2356_v38, 0.0 }
 0x1dd   : >> { %1649 = vmatpush1.bf16.msra.mxu0 %v1611_v55  ;;  %v814_v13 = vsub.f32 %v654_v20, %v782_v53  ;;  %v1098_v10 = vsel %vm1026_vm9, %v2356_v38, 0.0  ;;  %v1160_v52 = vadd.f32 %v1096_v61, %v952_v45  ;;  %vm881_vm10 = vcmp.eq.f32.partialorder %v750_v12, %v2373_v0 }
 0x1de   : >> { %v1162_v60 = vadd.f32 %v1098_v10, %v954_v11  ;;  %vm1232_vm11 = vcmp.eq.f32.partialorder %v813_v48, %v2359_v58  ;;  %vm1376_vm12 = vcmp.eq.f32.partialorder %v813_v48, %v2367_v62  ;;  %v951_v24 = vsel %vm879_vm7, %v2377_v1, 0.0 }
 0x1df   : >> { %vm1234_vm13 = vcmp.eq.f32.partialorder %v814_v13, %v2359_v58  ;;  %v1304_v14 = vsel %vm1232_vm11, %v2363_v59, 0.0  ;;  %vm1378_vm14 = vcmp.eq.f32.partialorder %v814_v13, %v2367_v62  ;;  %v1448_v4 = vsel %vm1376_vm12, %v2370_v63, 0.0 }
 0x1e0   : >> { %v1306_v20 = vsel %vm1234_vm13, %v2363_v59, 0.0  ;;  %v1450_v31 = vsel %vm1378_vm14, %v2370_v63, 0.0  ;;  %v1512_v51 = vadd.f32 %v1448_v4, %v1304_v14  ;;  %v953_v19 = vsel %vm881_vm10, %v2377_v1, 0.0 }
 0x1e1   : >> { %v1514_v35 = vadd.f32 %v1450_v31, %v1306_v20  ;;  %vm1023_vm15 = vcmp.eq.f32.partialorder %v749_v23, %v2381_v2  ;;  %vm1025_vm0 = vcmp.eq.f32.partialorder %v750_v12, %v2381_v2  ;;  %vm1231_vm1 = vcmp.eq.f32.partialorder %v813_v48, %v2387_v5  ;;  %v3107_v12 = vld [vmem:[%s558_s14] sm:$0xff] }
 0x1e2   : >> { %v1576_v47 = vmul.f32 %v1512_v51, %v1160_v52  ;;  %v1095_v17 = vsel %vm1023_vm15, %v2384_v3, 0.0  ;;  %v1097_v16 = vsel %vm1025_vm0, %v2384_v3, 0.0  ;;  %vm1233_vm2 = vcmp.eq.f32.partialorder %v814_v13, %v2387_v5 }
 0x1e3   : >> { %v1578_v54 = vmul.f32 %v1514_v35, %v1162_v60  ;;  %v1159_v42 = vadd.f32 %v1095_v17, %v951_v24  ;;  %v1161_v15 = vadd.f32 %v1097_v16, %v953_v19  ;;  %v1303_v18 = vsel %vm1231_vm1, %v2391_v6, 0.0 }
 0x1e4   : >> { %v1305_v55 = vsel %vm1233_vm2, %v2391_v6, 0.0  ;;  %vm1375_vm3 = vcmp.eq.f32.partialorder %v813_v48, %v2395_v7  ;;  %vm1377_vm4 = vcmp.eq.f32.partialorder %v814_v13, %v2395_v7  ;;  %v688_v23 = vadd.f32 0.5, %v656_v46 }
 0x1e5   : >> { %v1614_v53 = vpack.c.bf16 %v1578_v54, %v1576_v47  ;;  %v1447_v45 = vsel %vm1375_vm3, %v2398_v8, 0.0  ;;  %v1449_v11 = vsel %vm1377_vm4, %v2398_v8, 0.0  ;;  %v719_v61 = vmul.f32 0.0625, %v687_v41 }
 0x1e6   : >> { %v1511_v10 = vadd.f32 %v1447_v45, %v1303_v18  ;;  %v1513_v52 = vadd.f32 %v1449_v11, %v1305_v55  ;;  %v720_v60 = vmul.f32 0.0625, %v688_v23  ;;  %v3112_v24 = vadd.s32 %v2336_v50, %v592_v22 }
 0x1e7   : >> { %1650 = vmatprep.subr.bf16.mxu0 %v1614_v53  ;;  %v751_v48 = vfloor.f32 %v719_v61  ;;  %v3116_v13 = vadd.s32 %v2336_v50, %v3063_v49  ;;  %v3120_v14 = vcombine.high %v3107_v12, %v3107_v12 }
 0x1e8   : >> { %v1575_v4 = vmul.f32 %v1511_v10, %v1159_v42  ;;  %v1577_v20 = vmul.f32 %v1513_v52, %v1161_v15  ;;  %v752_v31 = vfloor.f32 %v720_v60  ;;  %v657_v41 = vcvt.s32.f32 %v3112_v24 }
 0x1e9   : >> { %v783_v51 = vmul.f32 16.0, %v751_v48  ;;  %vm884_vm5 = vcmp.eq.f32.partialorder %v751_v48, %v2345_v37  ;;  %vm1028_vm6 = vcmp.eq.f32.partialorder %v751_v48, %v2353_v57  ;;  %vm883_vm7 = vcmp.eq.f32.partialorder %v751_v48, %v2373_v0 }
 0x1ea   : >> { %v1613_v22 = vpack.c.bf16 %v1577_v20, %v1575_v4  ;;  %v784_v19 = vmul.f32 16.0, %v752_v31  ;;  %vm886_vm8 = vcmp.eq.f32.partialorder %v752_v31, %v2345_v37  ;;  %v956_v50 = vsel %vm884_vm5, %v2349_v56, 0.0 }
 0x1eb   : >> { %v815_v49 = vsub.f32 %v655_v21, %v783_v51  ;;  %v958_v35 = vsel %vm886_vm8, %v2349_v56, 0.0  ;;  %vm1030_vm9 = vcmp.eq.f32.partialorder %v752_v31, %v2353_v57  ;;  %v1100_v47 = vsel %vm1028_vm6, %v2356_v38, 0.0 }
 0x1ec   : >> { %1651 = vmatpush1.bf16.msra.mxu0 %v1613_v22  ;;  %v816_v17 = vsub.f32 %v656_v46, %v784_v19  ;;  %v1102_v16 = vsel %vm1030_vm9, %v2356_v38, 0.0  ;;  %v1164_v54 = vadd.f32 %v1100_v47, %v956_v50  ;;  %vm885_vm10 = vcmp.eq.f32.partialorder %v752_v31, %v2373_v0 }
 0x1ed   : >> { %v1166_v42 = vadd.f32 %v1102_v16, %v958_v35  ;;  %vm1236_vm11 = vcmp.eq.f32.partialorder %v815_v49, %v2359_v58  ;;  %vm1380_vm12 = vcmp.eq.f32.partialorder %v815_v49, %v2367_v62  ;;  %v955_v36 = vsel %vm883_vm7, %v2377_v1, 0.0 }
 0x1ee   : >> { %vm1238_vm13 = vcmp.eq.f32.partialorder %v816_v17, %v2359_v58  ;;  %v1308_v21 = vsel %vm1236_vm11, %v2363_v59, 0.0  ;;  %vm1382_vm14 = vcmp.eq.f32.partialorder %v816_v17, %v2367_v62  ;;  %v1452_v9 = vsel %vm1380_vm12, %v2370_v63, 0.0 }
 0x1ef   : >> { %v1310_v46 = vsel %vm1238_vm13, %v2363_v59, 0.0  ;;  %v1454_v15 = vsel %vm1382_vm14, %v2370_v63, 0.0  ;;  %v1516_v18 = vadd.f32 %v1452_v9, %v1308_v21  ;;  %v957_v55 = vsel %vm885_vm10, %v2377_v1, 0.0 }
 0x1f0   : >> { %v1518_v23 = vadd.f32 %v1454_v15, %v1310_v46  ;;  %vm1027_vm15 = vcmp.eq.f32.partialorder %v751_v48, %v2381_v2  ;;  %vm1029_vm0 = vcmp.eq.f32.partialorder %v752_v31, %v2381_v2  ;;  %vm1235_vm1 = vcmp.eq.f32.partialorder %v815_v49, %v2387_v5 }
 0x1f1   : >> { %v1580_v53 = vmul.f32 %v1516_v18, %v1164_v54  ;;  %v1099_v45 = vsel %vm1027_vm15, %v2384_v3, 0.0  ;;  %v1101_v11 = vsel %vm1029_vm0, %v2384_v3, 0.0  ;;  %vm1237_vm2 = vcmp.eq.f32.partialorder %v816_v17, %v2387_v5 }
 0x1f2   : >> { %v1582_v61 = vmul.f32 %v1518_v23, %v1166_v42  ;;  %v1163_v10 = vadd.f32 %v1099_v45, %v955_v36  ;;  %v1165_v52 = vadd.f32 %v1101_v11, %v957_v55  ;;  %v1307_v60 = vsel %vm1235_vm1, %v2391_v6, 0.0 }
 0x1f3   : >> { %v1309_v4 = vsel %vm1237_vm2, %v2391_v6, 0.0  ;;  %vm1379_vm3 = vcmp.eq.f32.partialorder %v815_v49, %v2395_v7  ;;  %vm1381_vm4 = vcmp.eq.f32.partialorder %v816_v17, %v2395_v7  ;;  %v658_v48 = vcvt.s32.f32 %v3116_v13 }
 0x1f4   : >> { %v1616_v20 = vpack.c.bf16 %v1582_v61, %v1580_v53  ;;  %v1451_v31 = vsel %vm1379_vm3, %v2398_v8, 0.0  ;;  %v1453_v51 = vsel %vm1381_vm4, %v2398_v8, 0.0  ;;  %v689_v22 = vadd.f32 0.5, %v657_v41 }
 0x1f5   : >> { %v1515_v19 = vadd.f32 %v1451_v31, %v1307_v60  ;;  %v1517_v50 = vadd.f32 %v1453_v51, %v1309_v4  ;;  %v690_v35 = vadd.f32 0.5, %v658_v48  ;;  %v1623_v47 = vpack.c.bf16 %v3120_v14, %v3120_v14 }
 0x1f6   : >> { %1652 = vmatprep.subr.bf16.mxu0 %v1616_v20  ;;  %v721_v49 = vmul.f32 0.0625, %v689_v22 }
 0x1f7   : >> { %v1579_v16 = vmul.f32 %v1515_v19, %v1163_v10  ;;  %v1581_v17 = vmul.f32 %v1517_v50, %v1165_v52  ;;  %v722_v54 = vmul.f32 0.0625, %v690_v35  ;;  %1656 = vmatprep.mubr.bf16.mxu0 %v1623_v47 }
 0x1f8   : >> { %v753_v13 = vfloor.f32 %v721_v49 }
 0x1f9   : >> { %v1615_v42 = vpack.c.bf16 %v1581_v17, %v1579_v16  ;;  %v754_v36 = vfloor.f32 %v722_v54 }
 0x1fa   : >> { %v785_v21 = vmul.f32 16.0, %v753_v13  ;;  %vm888_vm5 = vcmp.eq.f32.partialorder %v753_v13, %v2345_v37  ;;  %vm1032_vm6 = vcmp.eq.f32.partialorder %v753_v13, %v2353_v57  ;;  %vm887_vm7 = vcmp.eq.f32.partialorder %v753_v13, %v2373_v0 }
 0x1fb   : >> { %1653 = vmatpush1.bf16.msra.mxu0 %v1615_v42  ;;  %v786_v9 = vmul.f32 16.0, %v754_v36  ;;  %vm890_vm8 = vcmp.eq.f32.partialorder %v754_v36, %v2345_v37  ;;  %v960_v14 = vsel %vm888_vm5, %v2349_v56, 0.0  ;;  %vm1034_vm9 = vcmp.eq.f32.partialorder %v754_v36, %v2353_v57 }
 0x1fc   : >> { %v817_v46 = vsub.f32 %v657_v41, %v785_v21  ;;  %v962_v15 = vsel %vm890_vm8, %v2349_v56, 0.0  ;;  %v1104_v18 = vsel %vm1032_vm6, %v2356_v38, 0.0  ;;  %v1106_v55 = vsel %vm1034_vm9, %v2356_v38, 0.0 }
 0x1fd   : >> { %v818_v23 = vsub.f32 %v658_v48, %v786_v9  ;;  %v1168_v53 = vadd.f32 %v1104_v18, %v960_v14  ;;  %v1170_v45 = vadd.f32 %v1106_v55, %v962_v15  ;;  %vm889_vm10 = vcmp.eq.f32.partialorder %v754_v36, %v2373_v0 }
 0x1fe   : >> { %vm1240_vm11 = vcmp.eq.f32.partialorder %v817_v46, %v2359_v58  ;;  %vm1384_vm12 = vcmp.eq.f32.partialorder %v817_v46, %v2367_v62  ;;  %v959_v37 = vsel %vm887_vm7, %v2377_v1, 0.0  ;;  %v961_v57 = vsel %vm889_vm10, %v2377_v1, 0.0 }
 0x1ff   : >> { %vm1242_vm13 = vcmp.eq.f32.partialorder %v818_v23, %v2359_v58  ;;  %v1312_v56 = vsel %vm1240_vm11, %v2363_v59, 0.0  ;;  %vm1386_vm14 = vcmp.eq.f32.partialorder %v818_v23, %v2367_v62  ;;  %v1456_v38 = vsel %vm1384_vm12, %v2370_v63, 0.0 }
 0x200   : >> { %v1314_v24 = vsel %vm1242_vm13, %v2363_v59, 0.0  ;;  %v1458_v41 = vsel %vm1386_vm14, %v2370_v63, 0.0  ;;  %v1520_v11 = vadd.f32 %v1456_v38, %v1312_v56  ;;  %vm1031_vm15 = vcmp.eq.f32.partialorder %v753_v13, %v2381_v2 }
 0x201   : >> { %v1522_v61 = vadd.f32 %v1458_v41, %v1314_v24  ;;  %vm1033_vm0 = vcmp.eq.f32.partialorder %v754_v36, %v2381_v2  ;;  %v1103_v0 = vsel %vm1031_vm15, %v2384_v3, 0.0  ;;  %vm1239_vm1 = vcmp.eq.f32.partialorder %v817_v46, %v2387_v5 }
 0x202   : >> { %v1584_v58 = vmul.f32 %v1520_v11, %v1168_v53  ;;  %v1105_v1 = vsel %vm1033_vm0, %v2384_v3, 0.0  ;;  %vm1241_vm2 = vcmp.eq.f32.partialorder %v818_v23, %v2387_v5  ;;  %v1311_v59 = vsel %vm1239_vm1, %v2391_v6, 0.0 }
 0x203   : >> { %v1586_v62 = vmul.f32 %v1522_v61, %v1170_v45  ;;  %v1313_v63 = vsel %vm1241_vm2, %v2391_v6, 0.0  ;;  %v1167_v10 = vadd.f32 %v1103_v0, %v959_v37  ;;  %v1169_v52 = vadd.f32 %v1105_v1, %v961_v57 }
 0x204   : >> { %vm1383_vm3 = vcmp.eq.f32.partialorder %v817_v46, %v2395_v7  ;;  %vm1385_vm4 = vcmp.eq.f32.partialorder %v818_v23, %v2395_v7  ;;  %v1622_v6 = vpack.c.bf16 %v3107_v12, %v3107_v12 }
 0x205   : >> { %v1618_v2 = vpack.c.bf16 %v1586_v62, %v1584_v58  ;;  %v1455_v60 = vsel %vm1383_vm3, %v2398_v8, 0.0  ;;  %v1457_v4 = vsel %vm1385_vm4, %v2398_v8, 0.0 }
 0x206   : >> { %v1519_v48 = vadd.f32 %v1455_v60, %v1311_v59  ;;  %v1521_v3 = vadd.f32 %v1457_v4, %v1313_v63 }
 0x207   : >> { %1654 = vmatprep.subr.bf16.mxu0 %v1618_v2 }
 0x208   : >> { %v1583_v5 = vmul.f32 %v1519_v48, %v1167_v10  ;;  %v1585_v20 = vmul.f32 %v1521_v3, %v1169_v52 }
 0x20a   : >> { %v1617_v31 = vpack.c.bf16 %v1585_v20, %v1583_v5 }
 0x20c   : >> { %1655 = vmatpush1.bf16.msra.mxu0 %v1617_v31 }
 0x20f   : >> { %1657 = vmatmul.mubr.bf16.vlgmr.msra.gmra.mrb[0].mxu0 %v1622_v6 }
 0x2e0   : > { %553 = sbr.rel (!%p550_p9) target bundleno = 259 (0x103), region = 85 }
 0x2e2   : >> { %v1658_v51 = vpop.f32.mrb[0].mxu0 }
 0x2e3   : >> { %v1665_v22 = vadd.f32 %v2084_v44, %v1658_v51   ;;  %v1660_v7 = vpop.f32.mrb[1].mxu0 }
 0x2e4   : >> { %v1666_v19 = vadd.f32 %v2080_v43, %v1660_v7   ;;  %v1662_v50 = vpop.f32.mrb[2].mxu0 }
 0x2e5   : >> { %v1663_v35 = vpop.f32.mrb[3].mxu0  ;;  %v3285_v44 = vmov %v1665_v22  ;;  %v3287_v42 = vmov (%p550_p9), %v1665_v22 }
 0x2e6   : >> { %v3284_v43 = vmov %v1666_v19  ;;  %v3286_v41 = vmov (%p550_p9), %v1666_v19 }
 0x2e7 PF: > { %v1669_v44 = vcombine.low %v2096_v42, %v2092_v41  ;;  %s1828_s16 = sshll.u32 %s2068_s8, 7  ;;  %s1689_s22 = sshll.u32 %s244_s0, 4  ;;  %v2096_v42 = vphi %v2310_v42, %v3287_v42   ;;  %v2092_v41 = vphi %v2308_v41, %v3286_v41   ;;  %s1690_s22 = int_to_ptr.vmem [resolvable:$true] %s1689_s22 }
 0x2e8   : > { %s3225_s27 = scalar_lea.hbm %s3277_s6, %s1828_s16  ;;  %s1673_s23 = scalar_lea.sflag [#allocation6], %s242_s25 }
 0x2e9   : > { %1671 = vst [vmem:[%s244_s0] sm:$0xff] %v1669_v44  ;;  %s1976_s24 = scalar_lea.vmem %s1690_s22, 128  ;;  %s2103_s21 = smov [#allocation5]  }
 0x2ea   : > { %p1977_p10 = scmp.ne.s32.totalorder %s1690_s22, %s1976_s24  ;;  %s1980_s28 = sshll.u32 %s2103_s21, 4  ;;  %s1981_s28 = int_to_ptr.vmem [resolvable:$false] %s1980_s28 }
 0x2eb   : > { %s1982_s8 = scalar_lea.vmem %s1981_s28, 256  ;;  %p1983_p13 = scmp.lt.s32.totalorder %s1690_s22, %s1981_s28 }
 0x2ec   : > { %p1978_p11 = pnand %p1977_p10, %p2185_p0  ;;  %p1984_p1 = scmp.lt.s32.totalorder %s1982_s8, %s1976_s24 }
 0x2ee   : > { %p1979_p12 = pneg %p1978_p11  ;;  %p1985_p2 = por %p1984_p1, %p1983_p13 }
 0x2f0   : > { %p1986_p3 = pnand %p1985_p2, %p1979_p12 }
 0x2f2   : > { %1989 = shalt.err (!%p1986_p3)
}
 0x2f3   : > { %s1990_s25 = scalar_lea.hbm %s3225_s27, 128  ;;  %s1994_s0 = scalar_lea.hbm %s3277_s6, 256 }
 0x2f4   : > { %p1991_p5 = scmp.ne.s32.totalorder %s3225_s27, %s1990_s25  ;;  %p1995_p8 = scmp.lt.u32.totalorder %s3225_s27, %s3277_s6 }
 0x2f5   : > { %p1996_p9 = scmp.lt.u32.totalorder %s1994_s0, %s1990_s25  ;;  %p1998_p11 = scmp.lt.u32.totalorder %s1990_s25, %s3225_s27 }
 0x2f6   : > { %p1992_p6 = pnand %p1991_p5, %p2185_p0 }
 0x2f7   : > { %p1997_p10 = por %p1996_p9, %p1995_p8 }
 0x2f8   : > { %p1993_p7 = pneg %p1992_p6 }
 0x2f9   : > { %p1999_p12 = por %p1998_p11, %p1997_p10 }
 0x2fb   : > { %p2000_p13 = pnand %p1999_p12, %p1993_p7 }
 0x2fd   : > { %2003 = shalt.err (!%p2000_p13)
}
 0x2fe   : > { %1829 = dma.vmem_to_hbm [thread:$0]  (%p2185_p0), %s1690_s22, 128, %s3225_s27, %s1673_s23  }
 0x2ff PF: > { %p1835_p1 = scmp.ge.s32.totalorder %s2076_s10, 2  ;;  %s1701_s14 = sand.u32 1, %s2056_s1  }
 0x300   : > { %s1702_s16 = scalar_lea.sflag [#allocation6], %s1701_s14 }
 0x301   : > { %p1832_p2 = pnand %p1835_p1, %p2192_p4 }
 0x303   : > { %2051 = dma.done.wait (!%p1832_p2), %s1702_s16, 128  }
 0x304   : > { %2053 = vsyncadd (!%p1832_p2), %s1702_s16, 4294967168  ;;  %s29_s10 = sadd.s32 1, %s2076_s10   ;;  %s3288_s1 = smov %s2060_s30 }
 0x305   : > { %p26_p3 = scmp.ge.s32.totalorder %s29_s10, 4   ;;  %s3289_s30 = smov %s2064_s7 }
 0x306   : > { %s3290_s7 = smov %s2198_s18  ;;  %s3291_s8 = smov %s2072_s9 }
 0x307   : > { %s3292_s9 = smov %s3294_s13  ;;  %28 = sbr.rel (!%p26_p3) target bundleno = 29 (0x1d), region = 96 }
 0x30e   :  { %1707 = vsyncpa [#allocation6], 1 }
 0x30f   :  { %1709 = vsyncpa [#allocation6 + $0x1], 1 }

</bundles_post_ra>
